<compile_context>
chip_gen: v7x
topology: tpu7x:2x2x1
jax: 0.10.0
libtpu: 0.0.40
codegen_flags: <defaults>
</compile_context>

<pallas_src>
import functools

import jax
import jax.numpy as jnp
from jax import lax
from jax.experimental import pallas as pl
from jax.experimental.pallas import tpu as pltpu

_N_PARAMS_PER_LAYER = 16


def _silu(x):
    return x * jax.nn.sigmoid(x)


# ----------------------------------------------------------------------------- #
# Fully fused GCN_EG forward kernel
# ----------------------------------------------------------------------------- #
def _gcn_eg_fused_kernel(xt_ref, eattr_ref, gstack_ref, aggT_ref, slab_ref, out_ref,
                         *, pos_dim, layer_cfgs, layer_slices, pool_slice,
                         lin_w_slice, lin_b_slice, inv_deg_slice,
                         update_coors, update_feats, norm_coors, coors_scale,
                         aggr_mean):
    """Whole GCN_EG forward: all EGNN layers + global_mean_pool + final Linear.

    Inputs:
      xt     (N, pos+f0) f32  : [positions | feats]  (mirrors torch.cat)
      eattr  (E, ea)     f32
      gstack (2E, N)     bf16 : rows 0..E-1 = onehot(dst)=x_i gather,
                                rows E..2E-1 = onehot(src)=x_j gather
      aggT   (N, E)      bf16 : 0/1 scatter-add (dst) aggregation matrix
      slab   (R, W)      f32  : all weights/biases + pool (+ 1/deg), row-stacked
    """
    f32 = jnp.float32

    def cut(sl):
        r0, nr, nc = sl
        return slab_ref[r0:r0 + nr, :nc]          # static VMEM window load

    xt = xt_ref[...]
    coors = xt[:, :pos_dim]                        # (N, 2)  VMEM-resident
    feats = xt[:, pos_dim:]                        # (N, f)  VMEM-resident
    eattr = eattr_ref[...]                         # (E, ea)

    g = gstack_ref[...].astype(f32)                # (2E, N) cast once, reused per layer
    n_edges = g.shape[0] // 2
    grel = g[n_edges:] - g[:n_edges]               # onehot(src) - onehot(dst), hoisted
    aggT = aggT_ref[...].astype(f32)               # (N, E)
    inv_deg = cut(inv_deg_slice) if aggr_mean else None   # (N,1) f32 post-scale

    for cfg, sls in zip(layer_cfgs, layer_slices):
        (w1xi, w1xj, w1ea, w1rd, b1, w2, b2, w3, b3, w4t, b4,
         w5f, w5m, b5, w6, b6) = [cut(s) for s in sls]

        # ---- edge gathers: ONE stacked matmul for (x_i | x_j), one for rel ----
        xij = jnp.dot(g, feats, preferred_element_type=f32)       # (2E, f)
        x_i = xij[:n_edges]
        x_j = xij[n_edges:]
        rel = jnp.dot(grel, coors, preferred_element_type=f32)    # (E, 2)
        rel_dist = jnp.sum(rel * rel, axis=-1, keepdims=True)     # (E, 1)

        # ---- edge MLP, split-weight form (no lane concatenate) ----
        if w1ea.shape[0] == 1:
            ea_term = eattr * w1ea                                 # VPU broadcast
        else:
            ea_term = jnp.dot(eattr, w1ea, preferred_element_type=f32)
        h = _silu(jnp.dot(x_i, w1xi, preferred_element_type=f32)
                  + jnp.dot(x_j, w1xj, preferred_element_type=f32)
                  + ea_term
                  + rel_dist * w1rd                                # VPU broadcast
                  + b1)
        m_ij = _silu(jnp.dot(h, w2, preferred_element_type=f32) + b2)   # (E, m)

        # ---- coordinate update ----
        if update_coors:
            cwh = _silu(jnp.dot(m_ij, w3, preferred_element_type=f32) + b3)  # (E, 4m)
            # width-1 output: VPU multiply + lane reduce instead of MXU matmul
            coor_w = jnp.sum(cwh * w4t, axis=-1, keepdims=True) + b4          # (E, 1)
            if norm_coors:
                rel_n = rel * (lax.rsqrt(jnp.maximum(rel_dist, 1e-16))
                               * coors_scale)                                  # EUP rsqrt
            else:
                rel_n = rel
            upd = jnp.dot(aggT, coor_w * rel_n, preferred_element_type=f32)   # (N, 2)
            if aggr_mean:
                upd = upd * inv_deg
            coors = coors + upd

        # ---- feature update ----
        if update_feats:
            m_i = jnp.dot(aggT, m_ij, preferred_element_type=f32)             # (N, m)
            if aggr_mean:
                m_i = m_i * inv_deg
            hid = _silu(jnp.dot(feats, w5f, preferred_element_type=f32)
                        + jnp.dot(m_i, w5m, preferred_element_type=f32) + b5)
            hid = jnp.dot(hid, w6, preferred_element_type=f32) + b6           # (N, out)
            if cfg["out_dim"] == cfg["feats_dim"]:
                hid = feats + hid                 # residual only when dims match
            feats = hid

    # ---- global_mean_pool + final Linear, reordered: (feats @ w) then pool @ . ----
    node_scores = jnp.dot(feats, cut(lin_w_slice), preferred_element_type=f32)  # (N, 1)
    out_ref[...] = (jnp.dot(cut(pool_slice), node_scores,
                            preferred_element_type=f32) + cut(lin_b_slice))


# ----------------------------------------------------------------------------- #
# Parameter init (deterministic, synthetic) — weights pre-split for the kernel
# ----------------------------------------------------------------------------- #
def _init_linear(key, fan_in, fan_out):
    kw, kb = jax.random.split(key)
    bound = 1.0 / (fan_in ** 0.5)
    w = jax.random.uniform(kw, (fan_in, fan_out), jnp.float32, -bound, bound)
    b = jax.random.uniform(kb, (1, fan_out), jnp.float32, -bound, bound)
    return w, b


def init_gcn_eg(key, output_dims, m_dims, update_feats, edge_attr_dim=1):
    params = {"layers": [], "cfgs": []}
    in_feats = 2
    for m_dim, out_dim in zip(m_dims, output_dims):
        key, *ks = jax.random.split(key, 7)
        d_e = edge_attr_dim + 1 + 2 * in_feats
        w1, b1 = _init_linear(ks[0], d_e, 2 * d_e)
        w2, b2 = _init_linear(ks[1], 2 * d_e, m_dim)
        w3, b3 = _init_linear(ks[2], m_dim, 4 * m_dim)
        w4, b4 = _init_linear(ks[3], 4 * m_dim, 1)
        w5, b5 = _init_linear(ks[4], in_feats + m_dim, 2 * in_feats)
        w6, b6 = _init_linear(ks[5], 2 * in_feats, out_dim)
        params["layers"].append(dict(
            # w1 rows correspond to [x_i | x_j | edge_attr | rel_dist]
            w1_xi=w1[:in_feats],
            w1_xj=w1[in_feats:2 * in_feats],
            w1_ea=w1[2 * in_feats:2 * in_feats + edge_attr_dim],
            w1_rd=w1[2 * in_feats + edge_attr_dim:],
            b1=b1, w2=w2, b2=b2, w3=w3, b3=b3,
            w4t=w4.T, b4=b4,
            # w5 rows correspond to [feats | m_i]
            w5_f=w5[:in_feats], w5_m=w5[in_feats:], b5=b5,
            w6=w6, b6=b6,
        ))
        params["cfgs"].append(dict(feats_dim=in_feats, m_dim=m_dim, out_dim=out_dim))
        if update_feats:
            in_feats = out_dim
    key, klin = jax.random.split(key)
    params["lin_w"], params["lin_b"] = _init_linear(klin, in_feats, 1)
    return params


# ----------------------------------------------------------------------------- #
# Forward wrapper: builds graph matrices + one packed weight slab, one pallas_call
# ----------------------------------------------------------------------------- #
_PARAM_ORDER = ("w1_xi", "w1_xj", "w1_ea", "w1_rd", "b1", "w2", "b2", "w3", "b3",
                "w4t", "b4", "w5_f", "w5_m", "b5", "w6", "b6")


def gcn_eg_forward(params, x, edge_index, edge_attr, positions, batch, *,
                   update_coors, update_feats, norm_coors, aggr, num_graphs):
    coors = positions.astype(jnp.float32)
    feats = x.astype(jnp.float32)
    n_nodes = coors.shape[0]
    pos_dim = coors.shape[1]

    src = edge_index[0]                       # j (message source)
    dst = edge_index[1]                       # i (message target / aggregation index)
    node_ids = jnp.arange(n_nodes)
    gdst = dst[:, None] == node_ids[None, :]                       # (E, N) bool
    gsrc = src[:, None] == node_ids[None, :]                       # (E, N) bool
    # stacked gather matrix: rows 0..E-1 -> x_i, rows E..2E-1 -> x_j.
    # 0/1 entries are exact in bf16 on every TPU generation's MXU.
    gstack = jnp.concatenate([gdst, gsrc], axis=0).astype(jnp.bfloat16)   # (2E, N)
    aggT = jnp.transpose(gdst).astype(jnp.bfloat16)                        # (N, E) 0/1

    aggr_mean = (aggr == "mean")
    inv_deg = None
    if aggr_mean:
        deg = jnp.sum(gdst.astype(jnp.float32), axis=0)[:, None]           # (N, 1)
        inv_deg = 1.0 / jnp.maximum(deg, 1.0)                              # f32 post-scale

    pool = (batch[None, :] == jnp.arange(num_graphs)[:, None]).astype(jnp.float32)
    pool = pool / jnp.maximum(jnp.sum(pool, axis=1, keepdims=True), 1.0)   # (B, N)

    xt = jnp.concatenate([coors, feats], axis=-1)   # mirrors torch.cat([positions, x])

    # ---- pack ALL parameters (+ pool, + 1/deg) into one f32 slab ----
    mats = []
    for lp in params["layers"]:
        mats += [lp[k] for k in _PARAM_ORDER]
    mats += [params["lin_w"], params["lin_b"], pool]
    if aggr_mean:
        mats += [inv_deg]
    width = max(int(m.shape[1]) for m in mats)
    slab_rows, slices, r = [], [], 0
    for m in mats:
        nr, nc = int(m.shape[0]), int(m.shape[1])
        slab_rows.append(jnp.pad(m.astype(jnp.float32), ((0, 0), (0, width - nc))))
        slices.append((r, nr, nc))
        r += nr
    slab = jnp.concatenate(slab_rows, axis=0)       # (R, W) — one input DMA

    n_layer = len(params["layers"])
    layer_slices = tuple(
        tuple(slices[i * _N_PARAMS_PER_LAYER:(i + 1) * _N_PARAMS_PER_LAYER])
        for i in range(n_layer))
    tail = n_layer * _N_PARAMS_PER_LAYER
    lin_w_slice, lin_b_slice, pool_slice = slices[tail], slices[tail + 1], slices[tail + 2]
    inv_deg_slice = slices[tail + 3] if aggr_mean else None

    layer_cfgs = tuple(dict(feats_dim=c["feats_dim"], out_dim=c["out_dim"])
                       for c in params["cfgs"])

    kernel = functools.partial(
        _gcn_eg_fused_kernel,
        pos_dim=pos_dim,
        layer_cfgs=layer_cfgs,
        layer_slices=layer_slices,
        pool_slice=pool_slice,
        lin_w_slice=lin_w_slice,
        lin_b_slice=lin_b_slice,
        inv_deg_slice=inv_deg_slice,
        update_coors=update_coors,
        update_feats=update_feats,
        norm_coors=norm_coors,
        coors_scale=1e-2,          # CoorsNorm scale_init, compile-time constant
        aggr_mean=aggr_mean,
    )
    vmem = pl.BlockSpec(memory_space=pltpu.MemorySpace.VMEM)
    return pl.pallas_call(
        kernel,
        out_shape=jax.ShapeDtypeStruct((num_graphs, 1), jnp.float32),
        in_specs=[vmem] * 5,
        out_specs=vmem,
    )(xt, edge_attr.astype(jnp.float32), gstack, aggT, slab)


# ----------------------------------------------------------------------------- #
if __name__ == "__main__":
    key = jax.random.PRNGKey(0)

    # small graph batch: 2 graphs, 8 nodes each, 48 directed edges (intra-graph)
    num_graphs = 2
    nodes_per_graph = 8
    n_nodes = num_graphs * nodes_per_graph
    edges_per_graph = 24
    n_edges = num_graphs * edges_per_graph

    k_x, k_pos, k_ea, k_src, k_dst, k_par = jax.random.split(key, 6)
    x = jax.random.normal(k_x, (n_nodes, 2), jnp.float32)
    positions = jax.random.normal(k_pos, (n_nodes, 2), jnp.float32)
    edge_attr = jax.random.normal(k_ea, (n_edges, 1), jnp.float32)

    offs = jnp.repeat(jnp.arange(num_graphs) * nodes_per_graph, edges_per_graph)
    src = jax.random.randint(k_src, (n_edges,), 0, nodes_per_graph) + offs
    dst = jax.random.randint(k_dst, (n_edges,), 0, nodes_per_graph) + offs
    edge_index = jnp.stack([src, dst], axis=0).astype(jnp.int32)
    batch = jnp.repeat(jnp.arange(num_graphs), nodes_per_graph).astype(jnp.int32)

    # module config (mirrors GCN_EG.__init__ args)
    output_dims = [8, 4]
    m_dims = [8, 8]
    update_coors = True
    update_feats = True
    norm_coors = True
    aggr = "add"
    # dropout = 0.0 (identity at inference)

    params = init_gcn_eg(k_par, output_dims, m_dims, update_feats)

    out = gcn_eg_forward(
        params, x, edge_index, edge_attr, positions, batch,
        update_coors=update_coors, update_feats=update_feats,
        norm_coors=norm_coors, aggr=aggr, num_graphs=num_graphs,
    )
    out = jax.block_until_ready(out)
    assert out.shape == (num_graphs, 1) and out.dtype == jnp.float32
    print("KERNEL_OK")
</pallas_src>

<mosaic_0001>
module attributes {stable_mosaic.version = 11 : i64} {
  func.func @_gcn_eg_fused_kernel(%arg0: memref<16x4xf32, #tpu.memory_space<vmem>>, %arg1: memref<48x1xf32, #tpu.memory_space<vmem>>, %arg2: memref<96x16xbf16, #tpu.memory_space<vmem>>, %arg3: memref<16x48xbf16, #tpu.memory_space<vmem>>, %arg4: memref<155x36xf32, #tpu.memory_space<vmem>>, %arg5: memref<2x1xf32, #tpu.memory_space<vmem>>) attributes {dimension_semantics = [], scalar_prefetch = 0 : i64, scratch_operands = 0 : i64, tpu.core_type = #tpu.core_type<tc>} {
    %c0 = arith.constant 0 : index
    %c0_0 = arith.constant 0 : index
    %0 = vector.load %arg0[%c0, %c0_0] : memref<16x4xf32, #tpu.memory_space<vmem>>, vector<16x4xf32>
    %1 = vector.extract_strided_slice %0 {offsets = [0, 0], sizes = [16, 2], strides = [1, 1]} : vector<16x4xf32> to vector<16x2xf32>
    %2 = vector.extract_strided_slice %0 {offsets = [0, 2], sizes = [16, 2], strides = [1, 1]} : vector<16x4xf32> to vector<16x2xf32>
    %c0_1 = arith.constant 0 : index
    %c0_2 = arith.constant 0 : index
    %3 = vector.load %arg1[%c0_1, %c0_2] : memref<48x1xf32, #tpu.memory_space<vmem>>, vector<48x1xf32>
    %c0_3 = arith.constant 0 : index
    %c0_4 = arith.constant 0 : index
    %4 = vector.load %arg2[%c0_3, %c0_4] : memref<96x16xbf16, #tpu.memory_space<vmem>>, vector<96x16xbf16>
    %5 = arith.extf %4 : vector<96x16xbf16> to vector<96x16xf32>
    %6 = vector.extract_strided_slice %5 {offsets = [48, 0], sizes = [48, 16], strides = [1, 1]} : vector<96x16xf32> to vector<48x16xf32>
    %7 = vector.extract_strided_slice %5 {offsets = [0, 0], sizes = [48, 16], strides = [1, 1]} : vector<96x16xf32> to vector<48x16xf32>
    %8 = arith.subf %6, %7 : vector<48x16xf32>
    %c0_5 = arith.constant 0 : index
    %c0_6 = arith.constant 0 : index
    %9 = vector.load %arg3[%c0_5, %c0_6] : memref<16x48xbf16, #tpu.memory_space<vmem>>, vector<16x48xbf16>
    %10 = arith.extf %9 : vector<16x48xbf16> to vector<16x48xf32>
    %c0_7 = arith.constant 0 : index
    %c0_8 = arith.constant 0 : index
    %11 = vector.load %arg4[%c0_7, %c0_8] : memref<155x36xf32, #tpu.memory_space<vmem>>, vector<2x12xf32>
    %c2 = arith.constant 2 : index
    %c0_9 = arith.constant 0 : index
    %12 = vector.load %arg4[%c2, %c0_9] : memref<155x36xf32, #tpu.memory_space<vmem>>, vector<2x12xf32>
    %c4 = arith.constant 4 : index
    %c0_10 = arith.constant 0 : index
    %13 = vector.load %arg4[%c4, %c0_10] : memref<155x36xf32, #tpu.memory_space<vmem>>, vector<1x12xf32>
    %c5 = arith.constant 5 : index
    %c0_11 = arith.constant 0 : index
    %14 = vector.load %arg4[%c5, %c0_11] : memref<155x36xf32, #tpu.memory_space<vmem>>, vector<1x12xf32>
    %c6 = arith.constant 6 : index
    %c0_12 = arith.constant 0 : index
    %15 = vector.load %arg4[%c6, %c0_12] : memref<155x36xf32, #tpu.memory_space<vmem>>, vector<1x12xf32>
    %c7 = arith.constant 7 : index
    %c0_13 = arith.constant 0 : index
    %16 = vector.load %arg4[%c7, %c0_13] : memref<155x36xf32, #tpu.memory_space<vmem>>, vector<12x8xf32>
    %c19 = arith.constant 19 : index
    %c0_14 = arith.constant 0 : index
    %17 = vector.load %arg4[%c19, %c0_14] : memref<155x36xf32, #tpu.memory_space<vmem>>, vector<1x8xf32>
    %c20 = arith.constant 20 : index
    %c0_15 = arith.constant 0 : index
    %18 = vector.load %arg4[%c20, %c0_15] : memref<155x36xf32, #tpu.memory_space<vmem>>, vector<8x32xf32>
    %c28 = arith.constant 28 : index
    %c0_16 = arith.constant 0 : index
    %19 = vector.load %arg4[%c28, %c0_16] : memref<155x36xf32, #tpu.memory_space<vmem>>, vector<1x32xf32>
    %c29 = arith.constant 29 : index
    %c0_17 = arith.constant 0 : index
    %20 = vector.load %arg4[%c29, %c0_17] : memref<155x36xf32, #tpu.memory_space<vmem>>, vector<1x32xf32>
    %c30 = arith.constant 30 : index
    %c0_18 = arith.constant 0 : index
    %21 = vector.load %arg4[%c30, %c0_18] : memref<155x36xf32, #tpu.memory_space<vmem>>, vector<1x1xf32>
    %c31 = arith.constant 31 : index
    %c0_19 = arith.constant 0 : index
    %22 = vector.load %arg4[%c31, %c0_19] : memref<155x36xf32, #tpu.memory_space<vmem>>, vector<2x4xf32>
    %c33 = arith.constant 33 : index
    %c0_20 = arith.constant 0 : index
    %23 = vector.load %arg4[%c33, %c0_20] : memref<155x36xf32, #tpu.memory_space<vmem>>, vector<8x4xf32>
    %c41 = arith.constant 41 : index
    %c0_21 = arith.constant 0 : index
    %24 = vector.load %arg4[%c41, %c0_21] : memref<155x36xf32, #tpu.memory_space<vmem>>, vector<1x4xf32>
    %c42 = arith.constant 42 : index
    %c0_22 = arith.constant 0 : index
    %25 = vector.load %arg4[%c42, %c0_22] : memref<155x36xf32, #tpu.memory_space<vmem>>, vector<4x8xf32>
    %c46 = arith.constant 46 : index
    %c0_23 = arith.constant 0 : index
    %26 = vector.load %arg4[%c46, %c0_23] : memref<155x36xf32, #tpu.memory_space<vmem>>, vector<1x8xf32>
    %cst = arith.constant dense<0.000000e+00> : vector<96x2xf32>
    %27 = tpu.matmul %5, %2, %cst {dimension_numbers = #tpu.dot_dimension_numbers<[1], [0], [0], [1], [0, 0, 1, 1], [], []>} : vector<96x16xf32>, vector<16x2xf32>, vector<96x2xf32> -> vector<96x2xf32>
    %28 = vector.extract_strided_slice %27 {offsets = [0, 0], sizes = [48, 2], strides = [1, 1]} : vector<96x2xf32> to vector<48x2xf32>
    %29 = vector.extract_strided_slice %27 {offsets = [48, 0], sizes = [48, 2], strides = [1, 1]} : vector<96x2xf32> to vector<48x2xf32>
    %cst_24 = arith.constant dense<0.000000e+00> : vector<48x2xf32>
    %30 = tpu.matmul %8, %1, %cst_24 {dimension_numbers = #tpu.dot_dimension_numbers<[1], [0], [0], [1], [0, 0, 1, 1], [], []>} : vector<48x16xf32>, vector<16x2xf32>, vector<48x2xf32> -> vector<48x2xf32>
    %31 = arith.mulf %30, %30 : vector<48x2xf32>
    %cst_25 = arith.constant dense<0.000000e+00> : vector<48xf32>
    %32 = vector.multi_reduction <add>, %31, %cst_25 [1] : vector<48x2xf32> to vector<48xf32>
    %33 = vector.shape_cast %32 : vector<48xf32> to vector<48x1xf32>
    %34 = vector.broadcast %3 : vector<48x1xf32> to vector<48x12xf32>
    %35 = vector.broadcast %13 : vector<1x12xf32> to vector<48x12xf32>
    %36 = arith.mulf %34, %35 : vector<48x12xf32>
    %cst_26 = arith.constant dense<0.000000e+00> : vector<48x12xf32>
    %37 = tpu.matmul %28, %11, %cst_26 {dimension_numbers = #tpu.dot_dimension_numbers<[1], [0], [0], [1], [0, 0, 1, 1], [], []>} : vector<48x2xf32>, vector<2x12xf32>, vector<48x12xf32> -> vector<48x12xf32>
    %cst_27 = arith.constant dense<0.000000e+00> : vector<48x12xf32>
    %38 = tpu.matmul %29, %12, %cst_27 {dimension_numbers = #tpu.dot_dimension_numbers<[1], [0], [0], [1], [0, 0, 1, 1], [], []>} : vector<48x2xf32>, vector<2x12xf32>, vector<48x12xf32> -> vector<48x12xf32>
    %39 = arith.addf %37, %38 : vector<48x12xf32>
    %40 = arith.addf %39, %36 : vector<48x12xf32>
    %41 = vector.broadcast %33 : vector<48x1xf32> to vector<48x12xf32>
    %42 = vector.broadcast %14 : vector<1x12xf32> to vector<48x12xf32>
    %43 = arith.mulf %41, %42 : vector<48x12xf32>
    %44 = arith.addf %40, %43 : vector<48x12xf32>
    %45 = vector.broadcast %15 : vector<1x12xf32> to vector<48x12xf32>
    %46 = arith.addf %44, %45 : vector<48x12xf32>
    %47 = arith.negf %46 : vector<48x12xf32>
    %48 = math.exp %47 : vector<48x12xf32>
    %cst_28 = arith.constant 1.000000e+00 : f32
    %49 = vector.broadcast %cst_28 : f32 to vector<48x12xf32>
    %50 = arith.addf %49, %48 : vector<48x12xf32>
    %51 = arith.divf %49, %50 : vector<48x12xf32>
    %52 = arith.mulf %46, %51 : vector<48x12xf32>
    %cst_29 = arith.constant dense<0.000000e+00> : vector<48x8xf32>
    %53 = tpu.matmul %52, %16, %cst_29 {dimension_numbers = #tpu.dot_dimension_numbers<[1], [0], [0], [1], [0, 0, 1, 1], [], []>} : vector<48x12xf32>, vector<12x8xf32>, vector<48x8xf32> -> vector<48x8xf32>
    %54 = vector.broadcast %17 : vector<1x8xf32> to vector<48x8xf32>
    %55 = arith.addf %53, %54 : vector<48x8xf32>
    %56 = arith.negf %55 : vector<48x8xf32>
    %57 = math.exp %56 : vector<48x8xf32>
    %cst_30 = arith.constant 1.000000e+00 : f32
    %58 = vector.broadcast %cst_30 : f32 to vector<48x8xf32>
    %59 = arith.addf %58, %57 : vector<48x8xf32>
    %60 = arith.divf %58, %59 : vector<48x8xf32>
    %61 = arith.mulf %55, %60 : vector<48x8xf32>
    %cst_31 = arith.constant dense<0.000000e+00> : vector<48x32xf32>
    %62 = tpu.matmul %61, %18, %cst_31 {dimension_numbers = #tpu.dot_dimension_numbers<[1], [0], [0], [1], [0, 0, 1, 1], [], []>} : vector<48x8xf32>, vector<8x32xf32>, vector<48x32xf32> -> vector<48x32xf32>
    %63 = vector.broadcast %19 : vector<1x32xf32> to vector<48x32xf32>
    %64 = arith.addf %62, %63 : vector<48x32xf32>
    %65 = arith.negf %64 : vector<48x32xf32>
    %66 = math.exp %65 : vector<48x32xf32>
    %cst_32 = arith.constant 1.000000e+00 : f32
    %67 = vector.broadcast %cst_32 : f32 to vector<48x32xf32>
    %68 = arith.addf %67, %66 : vector<48x32xf32>
    %69 = arith.divf %67, %68 : vector<48x32xf32>
    %70 = arith.mulf %64, %69 : vector<48x32xf32>
    %71 = vector.broadcast %20 : vector<1x32xf32> to vector<48x32xf32>
    %72 = arith.mulf %70, %71 : vector<48x32xf32>
    %cst_33 = arith.constant dense<0.000000e+00> : vector<48xf32>
    %73 = vector.multi_reduction <add>, %72, %cst_33 [1] : vector<48x32xf32> to vector<48xf32>
    %74 = vector.shape_cast %73 : vector<48xf32> to vector<48x1xf32>
    %75 = vector.broadcast %21 : vector<1x1xf32> to vector<48x1xf32>
    %76 = arith.addf %74, %75 : vector<48x1xf32>
    %cst_34 = arith.constant 1.000000e-16 : f32
    %77 = vector.broadcast %cst_34 : f32 to vector<48x1xf32>
    %78 = arith.maximumf %33, %77 : vector<48x1xf32>
    %79 = math.rsqrt %78 : vector<48x1xf32>
    %cst_35 = arith.constant 0.00999999977 : f32
    %80 = vector.broadcast %cst_35 : f32 to vector<48x1xf32>
    %81 = arith.mulf %79, %80 : vector<48x1xf32>
    %82 = vector.broadcast %81 : vector<48x1xf32> to vector<48x2xf32>
    %83 = arith.mulf %30, %82 : vector<48x2xf32>
    %84 = vector.broadcast %76 : vector<48x1xf32> to vector<48x2xf32>
    %85 = arith.mulf %84, %83 : vector<48x2xf32>
    %cst_36 = arith.constant dense<0.000000e+00> : vector<16x2xf32>
    %86 = tpu.matmul %10, %85, %cst_36 {dimension_numbers = #tpu.dot_dimension_numbers<[1], [0], [0], [1], [0, 0, 1, 1], [], []>} : vector<16x48xf32>, vector<48x2xf32>, vector<16x2xf32> -> vector<16x2xf32>
    %87 = arith.addf %1, %86 : vector<16x2xf32>
    %cst_37 = arith.constant dense<0.000000e+00> : vector<16x8xf32>
    %88 = tpu.matmul %10, %61, %cst_37 {dimension_numbers = #tpu.dot_dimension_numbers<[1], [0], [0], [1], [0, 0, 1, 1], [], []>} : vector<16x48xf32>, vector<48x8xf32>, vector<16x8xf32> -> vector<16x8xf32>
    %cst_38 = arith.constant dense<0.000000e+00> : vector<16x4xf32>
    %89 = tpu.matmul %2, %22, %cst_38 {dimension_numbers = #tpu.dot_dimension_numbers<[1], [0], [0], [1], [0, 0, 1, 1], [], []>} : vector<16x2xf32>, vector<2x4xf32>, vector<16x4xf32> -> vector<16x4xf32>
    %cst_39 = arith.constant dense<0.000000e+00> : vector<16x4xf32>
    %90 = tpu.matmul %88, %23, %cst_39 {dimension_numbers = #tpu.dot_dimension_numbers<[1], [0], [0], [1], [0, 0, 1, 1], [], []>} : vector<16x8xf32>, vector<8x4xf32>, vector<16x4xf32> -> vector<16x4xf32>
    %91 = arith.addf %89, %90 : vector<16x4xf32>
    %92 = vector.broadcast %24 : vector<1x4xf32> to vector<16x4xf32>
    %93 = arith.addf %91, %92 : vector<16x4xf32>
    %94 = arith.negf %93 : vector<16x4xf32>
    %95 = math.exp %94 : vector<16x4xf32>
    %cst_40 = arith.constant 1.000000e+00 : f32
    %96 = vector.broadcast %cst_40 : f32 to vector<16x4xf32>
    %97 = arith.addf %96, %95 : vector<16x4xf32>
    %98 = arith.divf %96, %97 : vector<16x4xf32>
    %99 = arith.mulf %93, %98 : vector<16x4xf32>
    %cst_41 = arith.constant dense<0.000000e+00> : vector<16x8xf32>
    %100 = tpu.matmul %99, %25, %cst_41 {dimension_numbers = #tpu.dot_dimension_numbers<[1], [0], [0], [1], [0, 0, 1, 1], [], []>} : vector<16x4xf32>, vector<4x8xf32>, vector<16x8xf32> -> vector<16x8xf32>
    %101 = vector.broadcast %26 : vector<1x8xf32> to vector<16x8xf32>
    %102 = arith.addf %100, %101 : vector<16x8xf32>
    %c47 = arith.constant 47 : index
    %c0_42 = arith.constant 0 : index
    %103 = vector.load %arg4[%c47, %c0_42] : memref<155x36xf32, #tpu.memory_space<vmem>>, vector<8x36xf32>
    %c55 = arith.constant 55 : index
    %c0_43 = arith.constant 0 : index
    %104 = vector.load %arg4[%c55, %c0_43] : memref<155x36xf32, #tpu.memory_space<vmem>>, vector<8x36xf32>
    %c63 = arith.constant 63 : index
    %c0_44 = arith.constant 0 : index
    %105 = vector.load %arg4[%c63, %c0_44] : memref<155x36xf32, #tpu.memory_space<vmem>>, vector<1x36xf32>
    %c64 = arith.constant 64 : index
    %c0_45 = arith.constant 0 : index
    %106 = vector.load %arg4[%c64, %c0_45] : memref<155x36xf32, #tpu.memory_space<vmem>>, vector<1x36xf32>
    %c65 = arith.constant 65 : index
    %c0_46 = arith.constant 0 : index
    %107 = vector.load %arg4[%c65, %c0_46] : memref<155x36xf32, #tpu.memory_space<vmem>>, vector<1x36xf32>
    %c66 = arith.constant 66 : index
    %c0_47 = arith.constant 0 : index
    %108 = vector.load %arg4[%c66, %c0_47] : memref<155x36xf32, #tpu.memory_space<vmem>>, vector<36x8xf32>
    %c102 = arith.constant 102 : index
    %c0_48 = arith.constant 0 : index
    %109 = vector.load %arg4[%c102, %c0_48] : memref<155x36xf32, #tpu.memory_space<vmem>>, vector<1x8xf32>
    %c114 = arith.constant 114 : index
    %c0_49 = arith.constant 0 : index
    %110 = vector.load %arg4[%c114, %c0_49] : memref<155x36xf32, #tpu.memory_space<vmem>>, vector<8x16xf32>
    %c122 = arith.constant 122 : index
    %c0_50 = arith.constant 0 : index
    %111 = vector.load %arg4[%c122, %c0_50] : memref<155x36xf32, #tpu.memory_space<vmem>>, vector<8x16xf32>
    %c130 = arith.constant 130 : index
    %c0_51 = arith.constant 0 : index
    %112 = vector.load %arg4[%c130, %c0_51] : memref<155x36xf32, #tpu.memory_space<vmem>>, vector<1x16xf32>
    %c131 = arith.constant 131 : index
    %c0_52 = arith.constant 0 : index
    %113 = vector.load %arg4[%c131, %c0_52] : memref<155x36xf32, #tpu.memory_space<vmem>>, vector<16x4xf32>
    %c147 = arith.constant 147 : index
    %c0_53 = arith.constant 0 : index
    %114 = vector.load %arg4[%c147, %c0_53] : memref<155x36xf32, #tpu.memory_space<vmem>>, vector<1x4xf32>
    %cst_54 = arith.constant dense<0.000000e+00> : vector<96x8xf32>
    %115 = tpu.matmul %5, %102, %cst_54 {dimension_numbers = #tpu.dot_dimension_numbers<[1], [0], [0], [1], [0, 0, 1, 1], [], []>} : vector<96x16xf32>, vector<16x8xf32>, vector<96x8xf32> -> vector<96x8xf32>
    %116 = vector.extract_strided_slice %115 {offsets = [0, 0], sizes = [48, 8], strides = [1, 1]} : vector<96x8xf32> to vector<48x8xf32>
    %117 = vector.extract_strided_slice %115 {offsets = [48, 0], sizes = [48, 8], strides = [1, 1]} : vector<96x8xf32> to vector<48x8xf32>
    %cst_55 = arith.constant dense<0.000000e+00> : vector<48x2xf32>
    %118 = tpu.matmul %8, %87, %cst_55 {dimension_numbers = #tpu.dot_dimension_numbers<[1], [0], [0], [1], [0, 0, 1, 1], [], []>} : vector<48x16xf32>, vector<16x2xf32>, vector<48x2xf32> -> vector<48x2xf32>
    %119 = arith.mulf %118, %118 : vector<48x2xf32>
    %cst_56 = arith.constant dense<0.000000e+00> : vector<48xf32>
    %120 = vector.multi_reduction <add>, %119, %cst_56 [1] : vector<48x2xf32> to vector<48xf32>
    %121 = vector.shape_cast %120 : vector<48xf32> to vector<48x1xf32>
    %122 = vector.broadcast %3 : vector<48x1xf32> to vector<48x36xf32>
    %123 = vector.broadcast %105 : vector<1x36xf32> to vector<48x36xf32>
    %124 = arith.mulf %122, %123 : vector<48x36xf32>
    %cst_57 = arith.constant dense<0.000000e+00> : vector<48x36xf32>
    %125 = tpu.matmul %116, %103, %cst_57 {dimension_numbers = #tpu.dot_dimension_numbers<[1], [0], [0], [1], [0, 0, 1, 1], [], []>} : vector<48x8xf32>, vector<8x36xf32>, vector<48x36xf32> -> vector<48x36xf32>
    %cst_58 = arith.constant dense<0.000000e+00> : vector<48x36xf32>
    %126 = tpu.matmul %117, %104, %cst_58 {dimension_numbers = #tpu.dot_dimension_numbers<[1], [0], [0], [1], [0, 0, 1, 1], [], []>} : vector<48x8xf32>, vector<8x36xf32>, vector<48x36xf32> -> vector<48x36xf32>
    %127 = arith.addf %125, %126 : vector<48x36xf32>
    %128 = arith.addf %127, %124 : vector<48x36xf32>
    %129 = vector.broadcast %121 : vector<48x1xf32> to vector<48x36xf32>
    %130 = vector.broadcast %106 : vector<1x36xf32> to vector<48x36xf32>
    %131 = arith.mulf %129, %130 : vector<48x36xf32>
    %132 = arith.addf %128, %131 : vector<48x36xf32>
    %133 = vector.broadcast %107 : vector<1x36xf32> to vector<48x36xf32>
    %134 = arith.addf %132, %133 : vector<48x36xf32>
    %135 = arith.negf %134 : vector<48x36xf32>
    %136 = math.exp %135 : vector<48x36xf32>
    %cst_59 = arith.constant 1.000000e+00 : f32
    %137 = vector.broadcast %cst_59 : f32 to vector<48x36xf32>
    %138 = arith.addf %137, %136 : vector<48x36xf32>
    %139 = arith.divf %137, %138 : vector<48x36xf32>
    %140 = arith.mulf %134, %139 : vector<48x36xf32>
    %cst_60 = arith.constant dense<0.000000e+00> : vector<48x8xf32>
    %141 = tpu.matmul %140, %108, %cst_60 {dimension_numbers = #tpu.dot_dimension_numbers<[1], [0], [0], [1], [0, 0, 1, 1], [], []>} : vector<48x36xf32>, vector<36x8xf32>, vector<48x8xf32> -> vector<48x8xf32>
    %142 = vector.broadcast %109 : vector<1x8xf32> to vector<48x8xf32>
    %143 = arith.addf %141, %142 : vector<48x8xf32>
    %144 = arith.negf %143 : vector<48x8xf32>
    %145 = math.exp %144 : vector<48x8xf32>
    %cst_61 = arith.constant 1.000000e+00 : f32
    %146 = vector.broadcast %cst_61 : f32 to vector<48x8xf32>
    %147 = arith.addf %146, %145 : vector<48x8xf32>
    %148 = arith.divf %146, %147 : vector<48x8xf32>
    %149 = arith.mulf %143, %148 : vector<48x8xf32>
    %cst_62 = arith.constant dense<0.000000e+00> : vector<16x8xf32>
    %150 = tpu.matmul %10, %149, %cst_62 {dimension_numbers = #tpu.dot_dimension_numbers<[1], [0], [0], [1], [0, 0, 1, 1], [], []>} : vector<16x48xf32>, vector<48x8xf32>, vector<16x8xf32> -> vector<16x8xf32>
    %cst_63 = arith.constant dense<0.000000e+00> : vector<16x16xf32>
    %151 = tpu.matmul %102, %110, %cst_63 {dimension_numbers = #tpu.dot_dimension_numbers<[1], [0], [0], [1], [0, 0, 1, 1], [], []>} : vector<16x8xf32>, vector<8x16xf32>, vector<16x16xf32> -> vector<16x16xf32>
    %cst_64 = arith.constant dense<0.000000e+00> : vector<16x16xf32>
    %152 = tpu.matmul %150, %111, %cst_64 {dimension_numbers = #tpu.dot_dimension_numbers<[1], [0], [0], [1], [0, 0, 1, 1], [], []>} : vector<16x8xf32>, vector<8x16xf32>, vector<16x16xf32> -> vector<16x16xf32>
    %153 = arith.addf %151, %152 : vector<16x16xf32>
    %154 = vector.broadcast %112 : vector<1x16xf32> to vector<16x16xf32>
    %155 = arith.addf %153, %154 : vector<16x16xf32>
    %156 = arith.negf %155 : vector<16x16xf32>
    %157 = math.exp %156 : vector<16x16xf32>
    %cst_65 = arith.constant 1.000000e+00 : f32
    %158 = vector.broadcast %cst_65 : f32 to vector<16x16xf32>
    %159 = arith.addf %158, %157 : vector<16x16xf32>
    %160 = arith.divf %158, %159 : vector<16x16xf32>
    %161 = arith.mulf %155, %160 : vector<16x16xf32>
    %cst_66 = arith.constant dense<0.000000e+00> : vector<16x4xf32>
    %162 = tpu.matmul %161, %113, %cst_66 {dimension_numbers = #tpu.dot_dimension_numbers<[1], [0], [0], [1], [0, 0, 1, 1], [], []>} : vector<16x16xf32>, vector<16x4xf32>, vector<16x4xf32> -> vector<16x4xf32>
    %163 = vector.broadcast %114 : vector<1x4xf32> to vector<16x4xf32>
    %164 = arith.addf %162, %163 : vector<16x4xf32>
    %c148 = arith.constant 148 : index
    %c0_67 = arith.constant 0 : index
    %165 = vector.load %arg4[%c148, %c0_67] : memref<155x36xf32, #tpu.memory_space<vmem>>, vector<4x1xf32>
    %cst_68 = arith.constant dense<0.000000e+00> : vector<16x1xf32>
    %166 = tpu.matmul %164, %165, %cst_68 {dimension_numbers = #tpu.dot_dimension_numbers<[1], [0], [0], [1], [0, 0, 1, 1], [], []>} : vector<16x4xf32>, vector<4x1xf32>, vector<16x1xf32> -> vector<16x1xf32>
    %c153 = arith.constant 153 : index
    %c0_69 = arith.constant 0 : index
    %167 = vector.load %arg4[%c153, %c0_69] : memref<155x36xf32, #tpu.memory_space<vmem>>, vector<2x16xf32>
    %cst_70 = arith.constant dense<0.000000e+00> : vector<2x1xf32>
    %168 = tpu.matmul %167, %166, %cst_70 {dimension_numbers = #tpu.dot_dimension_numbers<[1], [0], [0], [1], [0, 0, 1, 1], [], []>} : vector<2x16xf32>, vector<16x1xf32>, vector<2x1xf32> -> vector<2x1xf32>
    %c152 = arith.constant 152 : index
    %c0_71 = arith.constant 0 : index
    %169 = vector.load %arg4[%c152, %c0_71] : memref<155x36xf32, #tpu.memory_space<vmem>>, vector<1x1xf32>
    %170 = vector.broadcast %169 : vector<1x1xf32> to vector<2x1xf32>
    %171 = arith.addf %168, %170 : vector<2x1xf32>
    %c0_72 = arith.constant 0 : index
    %c0_73 = arith.constant 0 : index
    %172 = vector.load %arg5[%c0_72, %c0_73] : memref<2x1xf32, #tpu.memory_space<vmem>>, vector<2x1xf32>
    tpu.vector_store %arg5[%c0_72, %c0_73], %171 {strides = array<i32>} : memref<2x1xf32, #tpu.memory_space<vmem>>, vector<2x1xf32>,
    return
  }
}

</mosaic_0001>

<bundles_post_ra>
// kernel: tpu_custom_call.1
= control target key start
LH: loop header
LB: loop body
LE: loop exit
PB: predicated region body
PF: predicated region fallthrough
CT: control target
= control target key end

     0   :  { %s3661_s24 = smov 126   ;;  %vm87_vm0 = vcmask 130048   ;;  %v3662_v27 = vmov 0   ;;  %vm445_vm1 = vcmask 1041408   ;;  %vm368_vm2 = vcmask 15360   ;;  %s4190_s0 = inlined_call_operand.vmem [shape: f32[16,4], index: 0, kind: input, shape index: {}]   ;;  %s4191_s2 = inlined_call_operand.vmem [shape: bf16[96,16], index: 2, kind: input, shape index: {}]   ;;  %s4192_s1 = inlined_call_operand.vmem [shape: f32[48,1], index: 1, kind: input, shape index: {}]   ;;  %s4193_s4 = inlined_call_operand.vmem [shape: f32[155,36], index: 4, kind: input, shape index: {}]   ;;  %s4194_s3 = inlined_call_operand.vmem [shape: bf16[16,48], index: 3, kind: input, shape index: {}]   ;;  %s4195_s5 = inlined_call_operand.vmem [shape: f32[2,1], index: 5, kind: output, shape index: {}]  }
   0x1   :  { %v3700_v0 = vld [vmem:[%s4190_s0] sm:$0xff]  ;;  %v3705_v1 = vld [vmem:[%s4190_s0 + $0x8] sm:$0xff]  ;;  %v3020_v6 = vld [vmem:[%s4191_s2 + $0x18] sm:$0xff]   ;;  %3511 = vset.pattern.permute.xlu1 %v3662_v27  ;;  %3512 = vset.pattern.permute.xlu0 %v3662_v27  ;;  %vm757_vm3 = vcmask 1043456   ;;  %vm3663_vm4 = vmmov 1   ;;  %vm738_vm6 = vcmask 97280  }
   0x2   :  { %v2991_v2 = vld [vmem:[%s4191_s2] sm:$0xff]   ;;  %81 = vrot.lane.b32.xlu0 %v3700_v0, %s3661_s24  ;;  %v3420_v3 = vpack.c.bf16 %v3705_v1, %v3700_v0  ;;  %v3018_v7 = vld [vmem:[%s4191_s2 + $0x8] sm:$0xff]   ;;  %v3726_v9 = vunpack.c.l.bf16 %v3020_v6  ;;  %v3728_v10 = vunpack.c.h.bf16 %v3020_v6  ;;  %v3019_v13 = vld [vmem:[%s4191_s2 + $0x10] sm:$0xff]   ;;  %vm902_vm7 = vcmask 64512  }
   0x3   :  { %v3713_v4 = vunpack.c.l.bf16 %v2991_v2  ;;  %v3715_v5 = vunpack.c.h.bf16 %v2991_v2  ;;  %v3021_v8 = vld [vmem:[%s4191_s2 + $0x20] sm:$0xff]   ;;  %v3730_v11 = vunpack.c.l.bf16 %v3018_v7  ;;  %v3022_v14 = vld [vmem:[%s4191_s2 + $0x28] sm:$0xff]   ;;  %v3740_v15 = vunpack.c.h.bf16 %v3018_v7  ;;  %v24_v29 = vld [vmem:[%s4192_s1 + $0x10] sm:$0xff] }
   0x4   :  { %v3732_v12 = vunpack.c.l.bf16 %v3021_v8  ;;  %3421 = vmatprep.subr.bf16.mxu1 %v3420_v3  ;;  %v3742_v16 = vunpack.c.h.bf16 %v3021_v8  ;;  %v3744_v17 = vunpack.c.l.bf16 %v3019_v13  ;;  %v3760_v21 = vunpack.c.l.bf16 %v3022_v14  ;;  %v22_v28 = vld [vmem:[%s4192_s1] sm:$0xff]  ;;  %v23_v30 = vld [vmem:[%s4192_s1 + $0x8] sm:$0xff]  ;;  %v25_v31 = vld [vmem:[%s4192_s1 + $0x18] sm:$0xff] }
   0x5   :  { %3174 = vmatprep.mubr.msk.f32.mxu0 %vm87_vm0, %v3713_v4  ;;  %3423 = vmatpush3.bf16.msra.mxu1 %v3420_v3  ;;  %v3750_v18 = vsub.f32 %v3726_v9, %v3713_v4  ;;  %v3754_v19 = vsub.f32 %v3728_v10, %v3715_v5  ;;  %v3771_v23 = vunpack.c.h.bf16 %v3019_v13  ;;  %v3773_v24 = vunpack.c.h.bf16 %v3022_v14  ;;  %v63_v35 = vld [vmem:[%s4193_s4 + $0x2] sm:$0x3]  ;;  %v62_v46 = vld [vmem:[%s4193_s4] sm:$0x3]  ;;  %v27_v56 = vld [vmem:[%s4192_s1 + $0x28] sm:$0xff] }
   0x6   :  { %v3758_v20 = vsub.f32 %v3732_v12, %v3730_v11  ;;  %83 = vrot.lane.b32.xlu0 %v3705_v1, %s3661_s24  ;;  %v3769_v22 = vsub.f32 %v3742_v16, %v3740_v15  ;;  %v3779_v25 = vsub.f32 %v3760_v21, %v3744_v17  ;;  %389 = vperm.xlu1 %3511, %v22_v28   ;;  %v26_v55 = vld [vmem:[%s4192_s1 + $0x20] sm:$0xff]  ;;  %vm3425_vm5 = vmpackc.low %vm757_vm3, %vm3663_vm4  ;;  %vm1157_vm8 = vcmask 392192  }
   0x7   :  { %3196 = vmatprep.mubr.msk.f32.mxu1 %vm87_vm0, %v3750_v18  ;;  %v3785_v26 = vsub.f32 %v3773_v24, %v3771_v23  ;;  %3205 = vmatprep.subr.msk.mxu1 %vm445_vm1, %v63_v35  ;;  %vm1068_vm9 = vcmask 261120   ;;  %vm1503_vm10 = vcmask 31744   ;;  %vm2163_vm11 = vcmask 293888  }
   0x8   :  { %3197 = vmatmul.mubr.msk.f32.vlgmr.msra.gmra.mrb[0].mxu1 %vm87_vm0, %v3754_v19  ;;  %vm3665_vm12 = vmmov 0   ;;  %vm2828_vm13 = vcmask 1024  }
   0x9   :  { %3199 = vmatprep.mubr.msk.f32.mxu1 %vm87_vm0, %v3758_v20  ;;  %3206 = vmatpush3.msk.msra.mxu1 %vm445_vm1, %v63_v35 }
   0xa   :  { %399 = vperm.xlu0 %3512, %v24_v29   ;;  %394 = vperm.xlu1 %3511, %v23_v30  }
   0xb   :  { %3216 = vmatprep.subr.msk.mxu1 %vm445_vm1, %v62_v46 }
   0xc   :  { %3200 = vmatmul.mubr.msk.f32.gmra.mrb[2].mxu1 %vm87_vm0, %v3769_v22 }
   0xd   :  { %3202 = vmatprep.mubr.msk.f32.mxu1 %vm87_vm0, %v3779_v25 }
   0xe   :  { %404 = vperm.xlu1 %3511, %v25_v31  }
  0x10   :  { %3203 = vmatmul.mubr.msk.f32.gmra.mrb[4].mxu1 %vm87_vm0, %v3785_v26 }
  0x74   :  { %v3803_v32 = vpop.permute.xlu0 %81 }
  0x78   :  { %v3805_v33 = vpop.permute.xlu0 %83 }
  0x79   :  { %v3416_v34 = vpack.c.bf16 %v3805_v33, %v3803_v32 }
  0x7b   :  { %3417 = vmatprep.subr.bf16.mxu0 %v3416_v34 }
  0x7c   :  { %3419 = vmatpush3.bf16.msra.mxu0 %v3416_v34 }
  0x7f   :  { %3175 = vmatmul.mubr.msk.f32.vlgmr.msra.gmra.mrb[0].mxu0 %vm87_vm0, %v3715_v5 }
  0x80   :  { %3177 = vmatprep.mubr.msk.f32.mxu0 %vm87_vm0, %v3730_v11 }
  0x83   :  { %3178 = vmatmul.mubr.msk.f32.gmra.mrb[2].mxu0 %vm87_vm0, %v3740_v15 }
  0x84   :  { %3180 = vmatprep.mubr.msk.f32.mxu0 %vm87_vm0, %v3744_v17 }
  0x85   :  { %v3876_v62 = vpop.permute.xlu1 %389 }
  0x87   :  { %3181 = vmatmul.mubr.msk.f32.gmra.mrb[4].mxu0 %vm87_vm0, %v3771_v23 }
  0x88   :  { %3183 = vmatprep.mubr.msk.f32.mxu0 %vm87_vm0, %v3726_v9 }
  0x89   :  { %v3879_v6 = vpop.permute.xlu1 %394  ;;  %v3890_v28 = vpop.permute.xlu0 %399 }
  0x8b   :  { %3184 = vmatmul.mubr.msk.f32.gmra.mrb[6].mxu0 %vm87_vm0, %v3728_v10 }
  0x8c   :  { %3186 = vmatprep.mubr.msk.f32.mxu0 %vm87_vm0, %v3732_v12 }
  0x8d   :  { %v3885_v14 = vpop.permute.xlu1 %404 }
  0x8f   :  { %3187 = vmatmul.mubr.msk.f32.gmra.mrb[8].mxu0 %vm87_vm0, %v3742_v16 }
  0x90   :  { %3189 = vmatprep.mubr.msk.f32.mxu0 %vm87_vm0, %v3760_v21 }
  0x93   :  { %3190 = vmatmul.mubr.msk.f32.gmra.mrb[10].mxu0 %vm87_vm0, %v3773_v24 }
  0xdb   :  { %v3836_v36 = vpop.f32.mrb[0].mxu1 }
  0xdc   :  { %v363_v37 = vmul.f32 %v3836_v36, %v3836_v36  ;;  %v3840_v38 = vpop.f32.mrb[1].mxu1 }
  0xdd   :  { %v362_v39 = vmul.f32 %v3840_v38, %v3840_v38 }
  0xde   :  { %v372_v40 = vsel %vm368_vm2, %v363_v37, 0.0 }
  0xdf   :  { %373 = vadd.xlane.f32.xlu1 %v372_v40  ;;  %v3845_v41 = vpop.f32.mrb[2].mxu1  ;;  %v369_v43 = vsel %vm368_vm2, %v362_v39, 0.0 }
  0xe0   :  { %v365_v42 = vmul.f32 %v3845_v41, %v3845_v41  ;;  %v3850_v44 = vpop.f32.mrb[3].mxu1 }
  0xe1   :  { %v364_v45 = vmul.f32 %v3850_v44, %v3850_v44 }
  0xe2   :  { %v378_v49 = vsel %vm368_vm2, %v365_v42, 0.0 }
  0xe3   :  { %370 = vadd.xlane.f32.xlu1 %v369_v43  ;;  %v375_v47 = vsel %vm368_vm2, %v364_v45, 0.0  ;;  %v3859_v48 = vpop.f32.mrb[4].mxu1 }
  0xe4   :  { %376 = vadd.xlane.f32.xlu0 %v375_v47  ;;  %v367_v50 = vmul.f32 %v3859_v48, %v3859_v48  ;;  %v3864_v51 = vpop.f32.mrb[5].mxu1 }
  0xe5   :  { %v366_v52 = vmul.f32 %v3864_v51, %v3864_v51 }
  0xe6   :  { %v384_v53 = vsel %vm368_vm2, %v367_v50, 0.0 }
  0xe7   :  { %379 = vadd.xlane.f32.xlu1 %v378_v49  ;;  %v381_v54 = vsel %vm368_vm2, %v366_v52, 0.0 }
  0xe8   :  { %385 = vadd.xlane.f32.xlu0 %v384_v53 }
  0xeb   :  { %382 = vadd.xlane.f32.xlu1 %v381_v54 }
  0xfc   :  { %409 = vperm.xlu1 %3511, %v26_v55  }
  0xfe   :  { %414 = vperm.xlu0 %3512, %v27_v56  }
 0x152   :  { %v3176_v57 = vpop.f32.mrb[0].mxu0 }
 0x153   :  { %v190_v58 = vpop.f32.mrb[1].mxu0 }
 0x156   :  { %v3179_v59 = vpop.f32.mrb[2].mxu0 }
 0x157   :  { %v200_v60 = vpop.f32.mrb[3].mxu0 }
 0x15a   :  { %v3182_v61 = vpop.f32.mrb[4].mxu0 }
 0x15b   :  { %v210_v63 = vpop.f32.mrb[5].mxu0 }
 0x15e   :  { %v3185_v2 = vpop.f32.mrb[6].mxu0 }
 0x15f   :  { %v220_v3 = vpop.f32.mrb[7].mxu0 }
 0x160   :  { %3207 = vmatprep.mubr.msk.f32.mxu1 %vm368_vm2, %v220_v3 }
 0x161   :  { %3208 = vmatmul.mubr.msk.f32.vlgmr.msra.gmra.mrb[6].mxu1 %vm368_vm2, %v3185_v2 }
 0x162   :  { %v3188_v7 = vpop.f32.mrb[8].mxu0  ;;  %3217 = vmatpush3.msk.msra.mxu1 %vm445_vm1, %v62_v46 }
 0x163   :  { %v230_v8 = vpop.f32.mrb[9].mxu0 }
 0x164   :  { %3210 = vmatprep.mubr.msk.f32.mxu1 %vm368_vm2, %v230_v8 }
 0x165   :  { %3211 = vmatmul.mubr.msk.f32.gmra.mrb[8].mxu1 %vm368_vm2, %v3188_v7 }
 0x166   :  { %v3191_v13 = vpop.f32.mrb[10].mxu0 }
 0x167   :  { %v240_v27 = vpop.f32.mrb[11].mxu0 }
 0x168   :  { %3213 = vmatprep.mubr.msk.f32.mxu1 %vm368_vm2, %v240_v27 }
 0x169   :  { %3214 = vmatmul.mubr.msk.f32.gmra.mrb[10].mxu1 %vm368_vm2, %v3191_v13 }
 0x16a   :  { %3218 = vmatprep.mubr.msk.f32.mxu1 %vm368_vm2, %v190_v58 }
 0x16c   :  { %v374_v29 = vpop.xlane.xlu1 %373 }
 0x16d   :  { %3219 = vmatmul.mubr.msk.f32.vlgmr.msra.gmra.mrb[6].mxu1 %vm368_vm2, %v3176_v57  ;;  %v1098_v30 = vmax.f32 %v374_v29, 1e-16 }
 0x16e   :  { %3221 = vmatprep.mubr.msk.f32.mxu1 %vm368_vm2, %v200_v60 }
 0x16f   :  { %3513 = vrsqrt.f32 %v1098_v30 }
 0x170   :  { %v371_v31 = vpop.xlane.xlu1 %370 }
 0x171   :  { %3222 = vmatmul.mubr.msk.f32.gmra.mrb[8].mxu1 %vm368_vm2, %v3179_v59  ;;  %v1097_v34 = vmax.f32 %v371_v31, 1e-16  ;;  %v3895_v35 = vpop.xlane.xlu0 %376 }
 0x172   :  { %3224 = vmatprep.mubr.msk.f32.mxu1 %vm368_vm2, %v210_v63  ;;  %v1099_v37 = vmax.f32 %v3895_v35, 1e-16 }
 0x173   :  { %3515 = vrsqrt.f32 %v1097_v34 }
 0x174   :  { %v380_v39 = vpop.xlane.xlu1 %379  ;;  %3517 = vrsqrt.f32 %v1099_v37 }
 0x175   :  { %3225 = vmatmul.mubr.msk.f32.gmra.mrb[10].mxu1 %vm368_vm2, %v3182_v61  ;;  %v1100_v40 = vmax.f32 %v380_v39, 1e-16  ;;  %v3900_v42 = vpop.xlane.xlu0 %385 }
 0x176   :  { %v1102_v43 = vmax.f32 %v3900_v42, 1e-16 }
 0x177   :  { %3519 = vrsqrt.f32 %v1100_v40 }
 0x178   :  { %3521 = vrsqrt.f32 %v1102_v43  ;;  %v3903_v45 = vpop.xlane.xlu1 %382  ;;  %v2868_v43 = vld [vmem:[%s4193_s4 + $0x6] ss:$0 sm:$0xff] }
 0x179   :  { %v3514_v46 = vpop.eup %3513  ;;  %v1101_v47 = vmax.f32 %v3903_v45, 1e-16 }
 0x17a   :  { %v1110_v49 = vmul.f32 0.01, %v3514_v46 }
 0x17b   :  { %3523 = vrsqrt.f32 %v1101_v47 }
 0x17c   :  { %v3907_v50 = vmul.f32 %v3836_v36, %v1110_v49 }
 0x17d   :  { %v3516_v52 = vpop.eup %3515 }
 0x17e   :  { %v3518_v53 = vpop.eup %3517  ;;  %v1109_v54 = vmul.f32 0.01, %v3516_v52 }
 0x17f   :  { %v1111_v55 = vmul.f32 0.01, %v3518_v53  ;;  %v3944_v53 = vpop.permute.xlu0 %414 }
 0x180   :  { %v3910_v56 = vmul.f32 %v1109_v54, %v3840_v38  ;;  %v67_v38 = vld [vmem:[%s4193_s4 + $0x7] sm:$0xff] }
 0x181   :  { %v3520_v57 = vpop.eup %3519  ;;  %v3913_v58 = vmul.f32 %v1111_v55, %v3850_v44  ;;  %v68_v44 = vld [vmem:[%s4193_s4 + $0xf] sm:$0xf] }
 0x182   :  { %v3522_v59 = vpop.eup %3521  ;;  %v1112_v60 = vmul.f32 0.01, %v3520_v57  ;;  %v3424_v8 = vpack.c.bf16 %v68_v44, %v67_v38 }
 0x183   :  { %v1114_v61 = vmul.f32 0.01, %v3522_v59  ;;  %v3946_v59 = vpop.permute.xlu1 %409 }
 0x184   :  { %v3916_v63 = vmul.f32 %v3845_v41, %v1112_v60  ;;  %3426 = vmatprep.subr.msk.bf16.mxu0 %vm3425_vm5, %v3424_v8  ;;  %v2852_v41 = vld [vmem:[%s4193_s4 + $0x4] ss:$0 sm:$0xff] }
 0x185   :  { %v3524_v2 = vpop.eup %3523  ;;  %v3919_v36 = vmul.f32 %v3859_v48, %v1114_v61  ;;  %3429 = vmatpush3.bf16.msk.msra.mxu0 %vm3425_vm5, %v3424_v8  ;;  %v2867_v48 = vld [vmem:[%s4193_s4 + $0x5] ss:$0 sm:$0xff]  ;;  %v421_v13 = vmul.f32 %v2852_v41, %v3876_v62  ;;  %v424_v47 = vmul.f32 %v2852_v41, %v3885_v14  ;;  %v423_v52 = vmul.f32 %v2852_v41, %v3890_v28 }
 0x186   :  { %v1113_v3 = vmul.f32 0.01, %v3524_v2  ;;  %v671_v30 = vmul.f32 %v2867_v48, %v374_v29  ;;  %v670_v40 = vmul.f32 %v2867_v48, %v371_v31  ;;  %v673_v57 = vmul.f32 %v2867_v48, %v380_v39 }
 0x187   :  { %v672_v61 = vmul.f32 %v2867_v48, %v3895_v35  ;;  %v426_v38 = vmul.f32 %v2852_v41, %v3944_v53  ;;  %v675_v39 = vmul.f32 %v2867_v48, %v3900_v42 }
 0x188   :  { %v3922_v7 = vmul.f32 %v1113_v3, %v3864_v51  ;;  %v422_v51 = vmul.f32 %v2852_v41, %v3879_v6 }
 0x240   :  { %v3220_v27 = vpop.f32.mrb[6].mxu1 }
 0x241   :  { %v661_v34 = vadd.f32 %v3220_v27, %v422_v51  ;;  %v631_v37 = vpop.f32.mrb[7].mxu1  ;;  %v425_v51 = vmul.f32 %v2852_v41, %v3946_v59 }
 0x242   :  { %v660_v46 = vadd.f32 %v631_v37, %v421_v13 }
 0x243   :  { %v677_v49 = vadd.f32 %v671_v30, %v661_v34 }
 0x244   :  { %v676_v54 = vadd.f32 %v670_v40, %v660_v46  ;;  %v3223_v55 = vpop.f32.mrb[8].mxu1  ;;  %v674_v46 = vmul.f32 %v2867_v48, %v3903_v45 }
 0x245   :  { %v687_v29 = vadd.f32 %v2868_v43, %v677_v49  ;;  %v663_v60 = vadd.f32 %v3223_v55, %v424_v47  ;;  %v641_v31 = vpop.f32.mrb[9].mxu1 }
 0x246   :  { %v686_v2 = vadd.f32 %v2868_v43, %v676_v54  ;;  %v662_v3 = vadd.f32 %v641_v31, %v423_v52 }
 0x247   :  { %v2870_v44 = vmul.f32 -1.442695, %v687_v29  ;;  %v679_v8 = vadd.f32 %v673_v57, %v663_v60 }
 0x248   :  { %v2869_v13 = vmul.f32 -1.442695, %v686_v2  ;;  %v678_v27 = vadd.f32 %v672_v61, %v662_v3  ;;  %v3226_v30 = vpop.f32.mrb[10].mxu1 }
 0x249   :  { %3525 = vpow2.f32 %v2870_v44  ;;  %v689_v34 = vadd.f32 %v2868_v43, %v679_v8  ;;  %v665_v37 = vadd.f32 %v3226_v30, %v426_v38  ;;  %v651_v40 = vpop.f32.mrb[11].mxu1 }
 0x24a   :  { %3527 = vpow2.f32 %v2869_v13  ;;  %v688_v35 = vadd.f32 %v2868_v43, %v678_v27  ;;  %v664_v47 = vadd.f32 %v651_v40, %v425_v51 }
 0x24b   :  { %v2872_v49 = vmul.f32 -1.442695, %v689_v34  ;;  %v681_v52 = vadd.f32 %v675_v39, %v665_v37 }
 0x24c   :  { %v2871_v54 = vmul.f32 -1.442695, %v688_v35  ;;  %v680_v55 = vadd.f32 %v674_v46, %v664_v47 }
 0x24d   :  { %3529 = vpow2.f32 %v2872_v49  ;;  %v691_v41 = vadd.f32 %v2868_v43, %v681_v52 }
 0x24e   :  { %3531 = vpow2.f32 %v2871_v54  ;;  %v690_v57 = vadd.f32 %v2868_v43, %v680_v55 }
 0x24f   :  { %v2874_v60 = vmul.f32 -1.442695, %v691_v41 }
 0x250   :  { %v2873_v31 = vmul.f32 -1.442695, %v690_v57 }
 0x251   :  { %3533 = vpow2.f32 %v2874_v60 }
 0x252   :  { %3535 = vpow2.f32 %v2873_v31 }
 0x253   :  { %v3526_v42 = vpop.eup %3525 }
 0x254   :  { %v3528_v61 = vpop.eup %3527  ;;  %v711_v3 = vadd.f32 1.0, %v3526_v42 }
 0x255   :  { %v710_v38 = vadd.f32 1.0, %v3528_v61 }
 0x256   :  { %3537 = vrcp.f32 %v711_v3 }
 0x257   :  { %v3530_v45 = vpop.eup %3529  ;;  %3539 = vrcp.f32 %v710_v38 }
 0x258   :  { %v3532_v48 = vpop.eup %3531  ;;  %v713_v44 = vadd.f32 1.0, %v3530_v45 }
 0x259   :  { %v712_v8 = vadd.f32 1.0, %v3532_v48 }
 0x25a   :  { %3541 = vrcp.f32 %v713_v44 }
 0x25b   :  { %v3534_v51 = vpop.eup %3533  ;;  %3543 = vrcp.f32 %v712_v8 }
 0x25c   :  { %v3536_v13 = vpop.eup %3535  ;;  %v715_v27 = vadd.f32 1.0, %v3534_v51 }
 0x25d   :  { %v714_v43 = vadd.f32 1.0, %v3536_v13 }
 0x25e   :  { %3545 = vrcp.f32 %v715_v27 }
 0x25f   :  { %3547 = vrcp.f32 %v714_v43 }
 0x260   :  { %v3538_v30 = vpop.eup %3537 }
 0x261   :  { %v3540_v39 = vpop.eup %3539  ;;  %v729_v40 = vmul.f32 %v3538_v30, %v687_v29  ;;  %v70_v29 = vld [vmem:[%s4193_s4 + $0x14] sm:$0xff] }
 0x262   :  { %v728_v37 = vmul.f32 %v3540_v39, %v686_v2  ;;  %3240 = vmatprep.subr.mxu0 %v70_v29  ;;  %v2875_v2 = vld [vmem:[%s4193_s4 + $0x13] ss:$0 sm:$0xff] }
 0x264   :  { %v3542_v46 = vpop.eup %3541  ;;  %3231 = vmatprep.mubr.msk.f32.mxu0 %vm738_vm6, %v728_v37 }
 0x265   :  { %v3544_v47 = vpop.eup %3543  ;;  %3232 = vmatmul.mubr.msk.f32.vlgmr.msra.gmra.mrb[12].mxu0 %vm738_vm6, %v729_v40  ;;  %v731_v52 = vmul.f32 %v3542_v46, %v689_v34 }
 0x266   :  { %v730_v49 = vmul.f32 %v3544_v47, %v688_v35  ;;  %3241 = vmatpush3.msra.mxu0 %v70_v29 }
 0x268   :  { %v3546_v54 = vpop.eup %3545  ;;  %3234 = vmatprep.mubr.msk.f32.mxu0 %vm738_vm6, %v730_v49 }
 0x269   :  { %v3548_v55 = vpop.eup %3547  ;;  %3235 = vmatmul.mubr.msk.f32.gmra.mrb[14].mxu0 %vm738_vm6, %v731_v52  ;;  %v733_v31 = vmul.f32 %v3546_v54, %v691_v41 }
 0x26a   :  { %v732_v60 = vmul.f32 %v3548_v55, %v690_v57 }
 0x26c   :  { %3237 = vmatprep.mubr.msk.f32.mxu0 %vm738_vm6, %v732_v60 }
 0x26d   :  { %3238 = vmatmul.mubr.msk.f32.gmra.mrb[16].mxu0 %vm738_vm6, %v733_v31 }
 0x338   :  { %v3233_v34 = vpop.f32.mrb[12].mxu0 }
 0x339   :  { %v833_v35 = vadd.f32 %v3233_v34, %v2875_v2  ;;  %v827_v42 = vpop.f32.mrb[13].mxu0 }
 0x33a   :  { %v828_v61 = vadd.f32 %v2875_v2, %v827_v42 }
 0x33b   :  { %v2884_v57 = vmul.f32 -1.442695, %v833_v35 }
 0x33c   :  { %v2883_v41 = vmul.f32 -1.442695, %v828_v61  ;;  %v3236_v3 = vpop.f32.mrb[14].mxu0 }
 0x33d   :  { %3549 = vpow2.f32 %v2884_v57  ;;  %v843_v38 = vadd.f32 %v3236_v3, %v2875_v2  ;;  %v837_v45 = vpop.f32.mrb[15].mxu0 }
 0x33e   :  { %3551 = vpow2.f32 %v2883_v41  ;;  %v838_v48 = vadd.f32 %v2875_v2, %v837_v45 }
 0x33f   :  { %v2886_v44 = vmul.f32 -1.442695, %v843_v38 }
 0x340   :  { %v2885_v8 = vmul.f32 -1.442695, %v838_v48  ;;  %v3239_v51 = vpop.f32.mrb[16].mxu0 }
 0x341   :  { %3553 = vpow2.f32 %v2886_v44  ;;  %v853_v13 = vadd.f32 %v3239_v51, %v2875_v2  ;;  %v847_v27 = vpop.f32.mrb[17].mxu0 }
 0x342   :  { %3555 = vpow2.f32 %v2885_v8  ;;  %v848_v43 = vadd.f32 %v2875_v2, %v847_v27 }
 0x343   :  { %v2888_v30 = vmul.f32 -1.442695, %v853_v13 }
 0x344   :  { %v2887_v39 = vmul.f32 -1.442695, %v848_v43 }
 0x345   :  { %3557 = vpow2.f32 %v2888_v30 }
 0x346   :  { %3559 = vpow2.f32 %v2887_v39 }
 0x347   :  { %v3550_v37 = vpop.eup %3549 }
 0x348   :  { %v3552_v40 = vpop.eup %3551  ;;  %v875_v46 = vadd.f32 1.0, %v3550_v37 }
 0x349   :  { %v874_v47 = vadd.f32 1.0, %v3552_v40 }
 0x34a   :  { %3561 = vrcp.f32 %v875_v46 }
 0x34b   :  { %v3554_v49 = vpop.eup %3553  ;;  %3563 = vrcp.f32 %v874_v47 }
 0x34c   :  { %v3556_v52 = vpop.eup %3555  ;;  %v877_v54 = vadd.f32 1.0, %v3554_v49 }
 0x34d   :  { %v876_v55 = vadd.f32 1.0, %v3556_v52 }
 0x34e   :  { %3565 = vrcp.f32 %v877_v54 }
 0x34f   :  { %v3558_v60 = vpop.eup %3557  ;;  %3567 = vrcp.f32 %v876_v55 }
 0x350   :  { %v3560_v31 = vpop.eup %3559  ;;  %v879_v29 = vadd.f32 1.0, %v3558_v60 }
 0x351   :  { %v878_v2 = vadd.f32 1.0, %v3560_v31 }
 0x352   :  { %3569 = vrcp.f32 %v879_v29 }
 0x353   :  { %3571 = vrcp.f32 %v878_v2 }
 0x354   :  { %v3562_v34 = vpop.eup %3561 }
 0x355   :  { %v3564_v42 = vpop.eup %3563  ;;  %v893_v57 = vmul.f32 %v3562_v34, %v833_v35 }
 0x356   :  { %v892_v41 = vmul.f32 %v3564_v42, %v828_v61 }
 0x358   :  { %v3566_v3 = vpop.eup %3565  ;;  %3242 = vmatprep.mubr.msk.f32.mxu0 %vm902_vm7, %v892_v41  ;;  %v3442_v45 = vpack.c.bf16 %v893_v57, %v892_v41 }
 0x359   :  { %v3568_v44 = vpop.eup %3567  ;;  %v895_v8 = vmul.f32 %v3566_v3, %v843_v38  ;;  %3243 = vmatmul.mubr.msk.f32.vlgmr.msra.gmra.mrb[18].mxu0 %vm902_vm7, %v893_v57  ;;  %v3015_v38 = vld [vmem:[%s4194_s3] sm:$0xff]  }
 0x35a   :  { %v894_v51 = vmul.f32 %v3568_v44, %v838_v48  ;;  %3443 = vmatprep.subr.bf16.mxu0 %v3442_v45  ;;  %v3974_v48 = vunpack.c.l.bf16 %v3015_v38 }
 0x35b   :  { %3445 = vmatpush3.bf16.msra.mxu0 %v3442_v45 }
 0x35c   :  { %v3570_v27 = vpop.eup %3569  ;;  %3245 = vmatprep.mubr.msk.f32.mxu0 %vm902_vm7, %v894_v51  ;;  %v3446_v30 = vpack.c.bf16 %v895_v8, %v894_v51  ;;  %3263 = vmatprep.mubr.msk.f32.mxu1 %vm1157_vm8, %v3974_v48 }
 0x35d   :  { %v3572_v39 = vpop.eup %3571  ;;  %v897_v37 = vmul.f32 %v3570_v27, %v853_v13  ;;  %3246 = vmatmul.mubr.msk.f32.gmra.mrb[20].mxu0 %vm902_vm7, %v895_v8  ;;  %v3976_v13 = vunpack.c.h.bf16 %v3015_v38 }
 0x35e   :  { %v896_v35 = vmul.f32 %v3572_v39, %v848_v43  ;;  %3447 = vmatprep.subr.bf16.mxu0 %v3446_v30  ;;  %v2889_v43 = vld [vmem:[%s4193_s4 + $0x1c] ss:$0 sm:$0xff] }
 0x35f   :  { %3449 = vmatpush3.bf16.msra.mxu0 %v3446_v30 }
 0x360   :  { %3248 = vmatprep.mubr.msk.f32.mxu0 %vm902_vm7, %v896_v35  ;;  %v3450_v61 = vpack.c.bf16 %v897_v37, %v896_v35 }
 0x361   :  { %3249 = vmatmul.mubr.msk.f32.gmra.mrb[22].mxu0 %vm902_vm7, %v897_v37 }
 0x362   :  { %3451 = vmatprep.subr.bf16.mxu0 %v3450_v61  ;;  %3278 = vmatprep.mubr.msk.f32.mxu0 %vm1157_vm8, %v3974_v48 }
 0x363   :  { %3453 = vmatpush3.bf16.msra.mxu0 %v3450_v61 }
 0x366   :  { %3279 = vmatmul.mubr.msk.f32.vlgmr.msra.gmra.mrb[24].mxu0 %vm1157_vm8, %v3976_v13 }
 0x367   :  { %3300 = vmatprep.mubr.msk.f32.mxu0 %vm87_vm0, %v3713_v4 }
 0x42c   :  { %v3244_v40 = vpop.f32.mrb[18].mxu0 }
 0x42d   :  { %v993_v46 = vadd.f32 %v3244_v40, %v2889_v43  ;;  %v987_v47 = vpop.f32.mrb[19].mxu0 }
 0x42e   :  { %v988_v49 = vadd.f32 %v2889_v43, %v987_v47 }
 0x42f   :  { %v2897_v52 = vmul.f32 -1.442695, %v993_v46 }
 0x430   :  { %v2896_v54 = vmul.f32 -1.442695, %v988_v49  ;;  %v3247_v55 = vpop.f32.mrb[20].mxu0 }
 0x431   :  { %3573 = vpow2.f32 %v2897_v52  ;;  %v1003_v60 = vadd.f32 %v3247_v55, %v2889_v43  ;;  %v997_v31 = vpop.f32.mrb[21].mxu0  ;;  %v2902_v52 = vld [vmem:[%s4193_s4 + $0x1d] ss:$0 sm:$0xff] }
 0x432   :  { %3575 = vpow2.f32 %v2896_v54  ;;  %v998_v29 = vadd.f32 %v2889_v43, %v997_v31 }
 0x433   :  { %v2899_v2 = vmul.f32 -1.442695, %v1003_v60 }
 0x434   :  { %v2898_v34 = vmul.f32 -1.442695, %v998_v29  ;;  %v3250_v42 = vpop.f32.mrb[22].mxu0 }
 0x435   :  { %3577 = vpow2.f32 %v2899_v2  ;;  %v1013_v4 = vadd.f32 %v3250_v42, %v2889_v43  ;;  %v1007_v57 = vpop.f32.mrb[23].mxu0 }
 0x436   :  { %3579 = vpow2.f32 %v2898_v34  ;;  %v1008_v41 = vadd.f32 %v2889_v43, %v1007_v57 }
 0x437   :  { %v2901_v3 = vmul.f32 -1.442695, %v1013_v4 }
 0x438   :  { %v2900_v45 = vmul.f32 -1.442695, %v1008_v41 }
 0x439   :  { %3581 = vpow2.f32 %v2901_v3 }
 0x43a   :  { %3583 = vpow2.f32 %v2900_v45 }
 0x43b   :  { %v3574_v44 = vpop.eup %3573 }
 0x43c   :  { %v3576_v8 = vpop.eup %3575  ;;  %v1035_v51 = vadd.f32 1.0, %v3574_v44 }
 0x43d   :  { %v1034_v27 = vadd.f32 1.0, %v3576_v8 }
 0x43e   :  { %3585 = vrcp.f32 %v1035_v51 }
 0x43f   :  { %v3578_v30 = vpop.eup %3577  ;;  %3587 = vrcp.f32 %v1034_v27 }
 0x440   :  { %v3580_v39 = vpop.eup %3579  ;;  %v1037_v37 = vadd.f32 1.0, %v3578_v30 }
 0x441   :  { %v1036_v35 = vadd.f32 1.0, %v3580_v39 }
 0x442   :  { %3589 = vrcp.f32 %v1037_v37 }
 0x443   :  { %v3582_v61 = vpop.eup %3581  ;;  %3591 = vrcp.f32 %v1036_v35 }
 0x444   :  { %v3584_v38 = vpop.eup %3583  ;;  %v1039_v40 = vadd.f32 1.0, %v3582_v61 }
 0x445   :  { %v1038_v43 = vadd.f32 1.0, %v3584_v38 }
 0x446   :  { %3593 = vrcp.f32 %v1039_v40 }
 0x447   :  { %3595 = vrcp.f32 %v1038_v43 }
 0x448   :  { %v3586_v47 = vpop.eup %3585 }
 0x449   :  { %v3588_v54 = vpop.eup %3587  ;;  %v1053_v55 = vmul.f32 %v3586_v47, %v993_v46 }
 0x44a   :  { %v1052_v31 = vmul.f32 %v3588_v54, %v988_v49 }
 0x44b   :  { %v1063_v2 = vmul.f32 %v2902_v52, %v1053_v55 }
 0x44c   :  { %v3590_v34 = vpop.eup %3589  ;;  %v1062_v42 = vmul.f32 %v2902_v52, %v1052_v31 }
 0x44d   :  { %v3592_v57 = vpop.eup %3591  ;;  %v1055_v3 = vmul.f32 %v3590_v34, %v1003_v60  ;;  %v1072_v45 = vsel %vm1068_vm9, %v1063_v2, 0.0 }
 0x44e   :  { %v1054_v44 = vmul.f32 %v3592_v57, %v998_v29  ;;  %1073 = vadd.xlane.f32.xlu0 %v1072_v45  ;;  %v1069_v8 = vsel %vm1068_vm9, %v1062_v42, 0.0 }
 0x44f   :  { %1070 = vadd.xlane.f32.xlu1 %v1069_v8  ;;  %v1065_v51 = vmul.f32 %v2902_v52, %v1055_v3  ;;  %v3280_v3 = vpop.f32.mrb[24].mxu0 }
 0x450   :  { %v3594_v27 = vpop.eup %3593  ;;  %v1064_v49 = vmul.f32 %v2902_v52, %v1054_v44  ;;  %v1307_v45 = vpop.f32.mrb[25].mxu0 }
 0x451   :  { %v3596_v30 = vpop.eup %3595  ;;  %v1057_v39 = vmul.f32 %v3594_v27, %v1013_v4  ;;  %v1078_v46 = vsel %vm1068_vm9, %v1065_v51, 0.0  ;;  %v2903_v4 = vld [vmem:[%s4193_s4 + $0x1e] ss:$0 sm:$0xff] }
 0x452   :  { %v1056_v37 = vmul.f32 %v3596_v30, %v1008_v41  ;;  %1079 = vadd.xlane.f32.xlu0 %v1078_v46  ;;  %v1075_v61 = vsel %vm1068_vm9, %v1064_v49, 0.0 }
 0x453   :  { %v1067_v60 = vmul.f32 %v2902_v52, %v1057_v39 }
 0x454   :  { %v1066_v35 = vmul.f32 %v2902_v52, %v1056_v37 }
 0x455   :  { %v1084_v38 = vsel %vm1068_vm9, %v1067_v60, 0.0 }
 0x456   :  { %1076 = vadd.xlane.f32.xlu0 %v1075_v61  ;;  %v1081_v29 = vsel %vm1068_vm9, %v1066_v35, 0.0 }
 0x457   :  { %1082 = vadd.xlane.f32.xlu1 %v1081_v29 }
 0x45a   :  { %1085 = vadd.xlane.f32.xlu0 %v1084_v38 }
 0x4db   :  { %v1074_v40 = vpop.xlane.xlu0 %1073 }
 0x4dc   :  { %v1092_v43 = vadd.f32 %v2903_v4, %v1074_v40  ;;  %v1071_v47 = vpop.xlane.xlu1 %1070 }
 0x4dd   :  { %v1091_v41 = vadd.f32 %v2903_v4, %v1071_v47 }
 0x4de   :  { %1128 = vperm.xlu0 %3512, %v1092_v43  }
 0x4df   :  { %v1080_v54 = vpop.xlane.xlu0 %1079  ;;  %1123 = vperm.xlu1 %3511, %v1091_v41  }
 0x4e0   :  { %v1094_v55 = vadd.f32 %v2903_v4, %v1080_v54 }
 0x4e3   :  { %v1077_v52 = vpop.xlane.xlu0 %1076  ;;  %1138 = vperm.xlu1 %3511, %v1094_v55  }
 0x4e4   :  { %v1093_v31 = vadd.f32 %v2903_v4, %v1077_v52  ;;  %v1083_v2 = vpop.xlane.xlu1 %1082 }
 0x4e5   :  { %v1095_v57 = vadd.f32 %v2903_v4, %v1083_v2 }
 0x4e7   :  { %v1086_v34 = vpop.xlane.xlu0 %1085  ;;  %1133 = vperm.xlu1 %3511, %v1093_v31  }
 0x4e8   :  { %v1096_v42 = vadd.f32 %v2903_v4, %v1086_v34 }
 0x4ea   :  { %1148 = vperm.xlu0 %3512, %v1096_v42  }
 0x4eb   :  { %1143 = vperm.xlu1 %3511, %v1095_v57  }
 0x55d   :  { %v1129_v44 = vpop.permute.xlu0 %1128 }
 0x55e   :  { %v1152_v8 = vmul.f32 %v1129_v44, %v3907_v50  ;;  %v1124_v51 = vpop.permute.xlu1 %1123 }
 0x55f   :  { %v1151_v27 = vmul.f32 %v1124_v51, %v3910_v56  ;;  %v75_v56 = vld [vmem:[%s4193_s4 + $0x21] sm:$0xff] }
 0x561   :  { %v3430_v30 = vpack.c.bf16 %v1152_v8, %v1151_v27 }
 0x562   :  { %v1139_v39 = vpop.permute.xlu1 %1138 }
 0x563   :  { %3431 = vmatprep.subr.bf16.mxu1 %v3430_v30  ;;  %v1154_v49 = vmul.f32 %v1139_v39, %v3916_v63  ;;  %v77_v63 = vld [vmem:[%s4193_s4 + $0x2a] sm:$0xf] }
 0x564   :  { %3433 = vmatpush3.bf16.msra.mxu1 %v3430_v30 }
 0x566   :  { %v1134_v46 = vpop.permute.xlu1 %1133 }
 0x567   :  { %v1153_v37 = vmul.f32 %v1134_v46, %v3913_v58  ;;  %v74_v58 = vld [vmem:[%s4193_s4 + $0x1f] sm:$0x3] }
 0x569   :  { %v3434_v35 = vpack.c.bf16 %v1154_v49, %v1153_v37  ;;  %v1149_v61 = vpop.permute.xlu0 %1148 }
 0x56a   :  { %v1156_v60 = vmul.f32 %v1149_v61, %v3919_v36  ;;  %v1144_v29 = vpop.permute.xlu1 %1143 }
 0x56b   :  { %v1155_v38 = vmul.f32 %v1144_v29, %v3922_v7  ;;  %3435 = vmatprep.subr.bf16.mxu1 %v3434_v35 }
 0x56c   :  { %3437 = vmatpush3.bf16.msra.mxu1 %v3434_v35 }
 0x56d   :  { %v3438_v50 = vpack.c.bf16 %v1156_v60, %v1155_v38 }
 0x56f   :  { %3439 = vmatprep.subr.bf16.mxu1 %v3438_v50 }
 0x570   :  { %3441 = vmatpush3.bf16.msra.mxu1 %v3438_v50 }
 0x571   :  { %3281 = vmatprep.subr.mxu1 %v75_v56 }
 0x573   :  { %3264 = vmatmul.mubr.msk.f32.vlgmr.msra.gmra.mrb[12].mxu1 %vm1157_vm8, %v3976_v13 }
 0x574   :  { %3282 = vmatpush3.msra.mxu1 %v75_v56  ;;  %3283 = vmatprep.mubr.msk.f32.mxu1 %vm902_vm7, %v1307_v45  ;;  %v2916_v45 = vld [vmem:[%s4193_s4 + $0x2e] ss:$0 sm:$0xff] }
 0x575   :  { %3286 = vmatprep.subr.msk.mxu1 %vm445_vm1, %v74_v58 }
 0x577   :  { %3284 = vmatmul.mubr.msk.f32.vlgmr.msra.gmra.mrb[14].mxu1 %vm902_vm7, %v3280_v3 }
 0x578   :  { %3287 = vmatpush3.msk.msra.mxu1 %vm445_vm1, %v74_v58  ;;  %3288 = vmatprep.mubr.msk.f32.mxu1 %vm368_vm2, %v3803_v32  ;;  %v2913_v32 = vld [vmem:[%s4193_s4 + $0x29] ss:$0 sm:$0xff] }
 0x579   :  { %3291 = vmatprep.subr.msk.mxu1 %vm757_vm3, %v77_v63 }
 0x57f   :  { %3289 = vmatmul.mubr.msk.f32.vlgmr.msra.gmra.mrb[14].mxu1 %vm368_vm2, %v3805_v33 }
 0x580   :  { %3292 = vmatpush3.msk.msra.mxu1 %vm757_vm3, %v77_v63 }
 0x646   :  { %v3265_v36 = vpop.f32.mrb[12].mxu1 }
 0x647   :  { %v1240_v7 = vadd.f32 %v3265_v36, %v3705_v1  ;;  %v1230_v4 = vpop.f32.mrb[13].mxu1 }
 0x648   :  { %v1239_v40 = vadd.f32 %v1230_v4, %v3700_v0  ;;  %v1593_v4 = vld [vmem:[%s4193_s4 + $0x42] sm:$0xff] }
 0x64a   :  { %v3458_v43 = vpack.c.bf16 %v1240_v7, %v1239_v40  ;;  %v1594_v40 = vld [vmem:[%s4193_s4 + $0x4a] sm:$0xff] }
 0x64c   :  { %3459 = vmatprep.subr.bf16.mxu1 %v3458_v43 }
 0x652   :  { %v3290_v33 = vpop.f32.mrb[14].mxu1 }
 0x653   :  { %v1484_v47 = vadd.f32 %v3290_v33, %v2913_v32  ;;  %v1470_v41 = vpop.f32.mrb[15].mxu1  ;;  %v1596_v33 = vld [vmem:[%s4193_s4 + $0x5a] sm:$0xff] }
 0x654   :  { %v1483_v54 = vadd.f32 %v2913_v32, %v1470_v41  ;;  %v1595_v32 = vld [vmem:[%s4193_s4 + $0x52] sm:$0xff]  ;;  %v1597_v41 = vld [vmem:[%s4193_s4 + $0x62] sm:$0xf] }
 0x655   :  { %v2915_v55 = vmul.f32 -1.442695, %v1484_v47 }
 0x656   :  { %v2914_v52 = vmul.f32 -1.442695, %v1483_v54 }
 0x657   :  { %3597 = vpow2.f32 %v2915_v55 }
 0x658   :  { %3599 = vpow2.f32 %v2914_v52  ;;  %v2938_v52 = vld [vmem:[%s4193_s4 + $0x3f] ss:$0 sm:$0xff] }
 0x661   :  { %v3598_v31 = vpop.eup %3597 }
 0x662   :  { %v3600_v2 = vpop.eup %3599  ;;  %v1492_v1 = vadd.f32 1.0, %v3598_v31  ;;  %v2951_v31 = vld [vmem:[%s4193_s4 + $0x40] ss:$0 sm:$0xff] }
 0x663   :  { %v1491_v34 = vadd.f32 1.0, %v3600_v2  ;;  %v1854_v2 = vmul.f32 %v2938_v52, %v3879_v6 }
 0x664   :  { %3601 = vrcp.f32 %v1492_v1 }
 0x665   :  { %3603 = vrcp.f32 %v1491_v34  ;;  %v1853_v34 = vmul.f32 %v2938_v52, %v3876_v62 }
 0x66e   :  { %v3602_v0 = vpop.eup %3601 }
 0x66f   :  { %v3604_v42 = vpop.eup %3603  ;;  %v1498_v3 = vmul.f32 %v3602_v0, %v1484_v47  ;;  %v3466_v47 = vpack.c.bf16 %v1596_v33, %v1595_v32 }
 0x670   :  { %v1497_v57 = vmul.f32 %v3604_v42, %v1483_v54 }
 0x672   :  { %3293 = vmatprep.mubr.msk.f32.mxu1 %vm1503_vm10, %v1497_v57 }
 0x673   :  { %3294 = vmatmul.mubr.msk.f32.vlgmr.msra.gmra.mrb[16].mxu1 %vm1503_vm10, %v1498_v3 }
 0x674   :  { %3461 = vmatpush3.bf16.msra.mxu1 %v3458_v43  ;;  %3322 = vmatprep.mubr.msk.f32.mxu1 %vm87_vm0, %v3750_v18  ;;  %v3462_v43 = vpack.c.bf16 %v1594_v40, %v1593_v4 }
 0x677   :  { %3323 = vmatmul.mubr.msk.f32.vlgmr.msra.gmra.mrb[18].mxu1 %vm87_vm0, %v3754_v19 }
 0x678   :  { %3325 = vmatprep.mubr.msk.f32.mxu1 %vm87_vm0, %v3758_v20 }
 0x67b   :  { %3326 = vmatmul.mubr.msk.f32.gmra.mrb[20].mxu1 %vm87_vm0, %v3769_v22 }
 0x67c   :  { %3328 = vmatprep.mubr.msk.f32.mxu1 %vm87_vm0, %v3779_v25 }
 0x67f   :  { %3329 = vmatmul.mubr.msk.f32.gmra.mrb[22].mxu1 %vm87_vm0, %v3785_v26 }
 0x746   :  { %v3295_v18 = vpop.f32.mrb[16].mxu1 }
 0x747   :  { %v4050_v44 = vadd.f32 %v3295_v18, %v2916_v45  ;;  %v1579_v19 = vpop.f32.mrb[17].mxu1 }
 0x748   :  { %v4052_v8 = vadd.f32 %v2916_v45, %v1579_v19  ;;  %v2952_v19 = vld [vmem:[%s4193_s4 + $0x41] ss:$0 sm:$0xff] }
 0x74a   :  { %v3454_v20 = vpack.c.bf16 %v4050_v44, %v4052_v8 }
 0x74c   :  { %3455 = vmatprep.subr.bf16.mxu0 %v3454_v20 }
 0x74d   :  { %3457 = vmatpush3.bf16.msra.mxu0 %v3454_v20 }
 0x74e   :  { %3463 = vmatprep.subr.bf16.mxu0 %v3462_v43 }
 0x750   :  { %3301 = vmatmul.mubr.msk.f32.vlgmr.msra.gmra.mrb[26].mxu0 %vm87_vm0, %v3715_v5  ;;  %v1589_v5 = vld [vmem:[%s4193_s4 + $0x37] sm:$0xff] }
 0x751   :  { %3303 = vmatprep.mubr.msk.f32.mxu0 %vm87_vm0, %v3730_v11  ;;  %3331 = vmatprep.subr.mxu1 %v1589_v5 }
 0x752   :  { %3332 = vmatpush3.msra.mxu1 %v1589_v5  ;;  %3465 = vmatpush3.bf16.msra.mxu0 %v3462_v43  ;;  %v1856_v5 = vmul.f32 %v2938_v52, %v3885_v14  ;;  %v1857_v14 = vmul.f32 %v2938_v52, %v3946_v59 }
 0x753   :  { %3467 = vmatprep.subr.bf16.mxu0 %v3466_v47 }
 0x754   :  { %3304 = vmatmul.mubr.msk.f32.gmra.mrb[28].mxu0 %vm87_vm0, %v3740_v15 }
 0x755   :  { %3306 = vmatprep.mubr.msk.f32.mxu0 %vm87_vm0, %v3744_v17 }
 0x756   :  { %3469 = vmatpush3.bf16.msra.mxu0 %v3466_v47 }
 0x757   :  { %3361 = vmatprep.subr.msk.mxu0 %vm757_vm3, %v1597_v41 }
 0x758   :  { %3307 = vmatmul.mubr.msk.f32.gmra.mrb[30].mxu0 %vm87_vm0, %v3771_v23 }
 0x759   :  { %3309 = vmatprep.mubr.msk.f32.mxu0 %vm87_vm0, %v3726_v9  ;;  %v1588_v9 = vld [vmem:[%s4193_s4 + $0x2f] sm:$0xff] }
 0x75a   :  { %3342 = vmatprep.subr.mxu1 %v1588_v9  ;;  %3362 = vmatpush3.msk.msra.mxu0 %vm757_vm3, %v1597_v41 }
 0x75c   :  { %3310 = vmatmul.mubr.msk.f32.gmra.mrb[32].mxu0 %vm87_vm0, %v3728_v10  ;;  %v3324_v10 = vpop.f32.mrb[18].mxu1 }
 0x75d   :  { %3312 = vmatprep.mubr.msk.f32.mxu0 %vm87_vm0, %v3732_v12  ;;  %v1826_v11 = vmul.f32 %v3324_v10, %v3324_v10  ;;  %v1796_v12 = vpop.f32.mrb[19].mxu1  ;;  %v1855_v10 = vmul.f32 %v2938_v52, %v3890_v28 }
 0x75e   :  { %v1825_v15 = vmul.f32 %v1796_v12, %v1796_v12 }
 0x75f   :  { %v1834_v17 = vsel %vm368_vm2, %v1826_v11, 0.0 }
 0x760   :  { %3313 = vmatmul.mubr.msk.f32.gmra.mrb[34].mxu0 %vm87_vm0, %v3742_v16  ;;  %v3327_v16 = vpop.f32.mrb[20].mxu1  ;;  %1835 = vadd.xlane.f32.xlu0 %v1834_v17  ;;  %v1831_v23 = vsel %vm368_vm2, %v1825_v15, 0.0 }
 0x761   :  { %3315 = vmatprep.mubr.msk.f32.mxu0 %vm87_vm0, %v3760_v21  ;;  %v1806_v21 = vpop.f32.mrb[21].mxu1  ;;  %v1828_v25 = vmul.f32 %v3327_v16, %v3327_v16  ;;  %1832 = vadd.xlane.f32.xlu1 %v1831_v23 }
 0x762   :  { %v1827_v22 = vmul.f32 %v1806_v21, %v1806_v21 }
 0x763   :  { %v1840_v39 = vsel %vm368_vm2, %v1828_v25, 0.0  ;;  %v1858_v25 = vmul.f32 %v2938_v52, %v3944_v53 }
 0x764   :  { %3316 = vmatmul.mubr.msk.f32.gmra.mrb[36].mxu0 %vm87_vm0, %v3773_v24  ;;  %v3330_v24 = vpop.f32.mrb[22].mxu1  ;;  %v1837_v51 = vsel %vm368_vm2, %v1827_v22, 0.0 }
 0x765   :  { %v1816_v26 = vpop.f32.mrb[23].mxu1  ;;  %1838 = vadd.xlane.f32.xlu0 %v1837_v51  ;;  %v1830_v46 = vmul.f32 %v3330_v24, %v3330_v24 }
 0x766   :  { %v1829_v27 = vmul.f32 %v1816_v26, %v1816_v26 }
 0x767   :  { %v1846_v49 = vsel %vm368_vm2, %v1830_v46, 0.0 }
 0x768   :  { %v1843_v30 = vsel %vm368_vm2, %v1829_v27, 0.0 }
 0x769   :  { %1844 = vadd.xlane.f32.xlu1 %v1843_v30  ;;  %1841 = vadd.xlane.f32.xlu0 %v1840_v39 }
 0x76d   :  { %1847 = vadd.xlane.f32.xlu0 %v1846_v49 }
 0x7ed   :  { %v1836_v54 = vpop.xlane.xlu0 %1835 }
 0x7ee   :  { %v1833_v1 = vpop.xlane.xlu1 %1832  ;;  %v2096_v57 = vmul.f32 %v2951_v31, %v1836_v54 }
 0x7ef   :  { %v2095_v18 = vmul.f32 %v2951_v31, %v1833_v1 }
 0x7f2   :  { %v1839_v55 = vpop.xlane.xlu0 %1838 }
 0x7f3   :  { %v2097_v22 = vmul.f32 %v2951_v31, %v1839_v55 }
 0x7f6   :  { %v1842_v42 = vpop.xlane.xlu0 %1841  ;;  %v1845_v21 = vpop.xlane.xlu1 %1844 }
 0x7f7   :  { %v2098_v15 = vmul.f32 %v2951_v31, %v1842_v42  ;;  %v2099_v46 = vmul.f32 %v2951_v31, %v1845_v21 }
 0x7fa   :  { %v1848_v12 = vpop.xlane.xlu0 %1847 }
 0x7fb   :  { %v2100_v27 = vmul.f32 %v2951_v31, %v1848_v12 }
 0x823   :  { %v3302_v37 = vpop.f32.mrb[26].mxu0 }
 0x824   :  { %v1671_v35 = vpop.f32.mrb[27].mxu0 }
 0x827   :  { %v3305_v61 = vpop.f32.mrb[28].mxu0 }
 0x828   :  { %v1681_v60 = vpop.f32.mrb[29].mxu0 }
 0x82b   :  { %v3308_v29 = vpop.f32.mrb[30].mxu0 }
 0x82c   :  { %v1691_v38 = vpop.f32.mrb[31].mxu0 }
 0x82f   :  { %v3311_v50 = vpop.f32.mrb[32].mxu0 }
 0x830   :  { %v1701_v56 = vpop.f32.mrb[33].mxu0 }
 0x831   :  { %3333 = vmatprep.mubr.msk.f32.mxu1 %vm902_vm7, %v1701_v56 }
 0x832   :  { %3334 = vmatmul.mubr.msk.f32.vlgmr.msra.gmra.mrb[24].mxu1 %vm902_vm7, %v3311_v50 }
 0x833   :  { %v3314_v58 = vpop.f32.mrb[34].mxu0  ;;  %3343 = vmatpush3.msra.mxu1 %v1588_v9 }
 0x834   :  { %v1711_v63 = vpop.f32.mrb[35].mxu0 }
 0x835   :  { %3336 = vmatprep.mubr.msk.f32.mxu1 %vm902_vm7, %v1711_v63 }
 0x836   :  { %3337 = vmatmul.mubr.msk.f32.gmra.mrb[26].mxu1 %vm902_vm7, %v3314_v58 }
 0x837   :  { %v3317_v36 = vpop.f32.mrb[36].mxu0 }
 0x838   :  { %v1721_v7 = vpop.f32.mrb[37].mxu0 }
 0x839   :  { %3339 = vmatprep.mubr.msk.f32.mxu1 %vm902_vm7, %v1721_v7 }
 0x83a   :  { %3340 = vmatmul.mubr.msk.f32.gmra.mrb[28].mxu1 %vm902_vm7, %v3317_v36 }
 0x83b   :  { %3344 = vmatprep.mubr.msk.f32.mxu1 %vm902_vm7, %v1671_v35 }
 0x83e   :  { %3345 = vmatmul.mubr.msk.f32.vlgmr.msra.gmra.mrb[24].mxu1 %vm902_vm7, %v3302_v37 }
 0x83f   :  { %3347 = vmatprep.mubr.msk.f32.mxu1 %vm902_vm7, %v1681_v60 }
 0x842   :  { %3348 = vmatmul.mubr.msk.f32.gmra.mrb[26].mxu1 %vm902_vm7, %v3305_v61 }
 0x843   :  { %3350 = vmatprep.mubr.msk.f32.mxu1 %vm902_vm7, %v1691_v38 }
 0x846   :  { %3351 = vmatmul.mubr.msk.f32.gmra.mrb[28].mxu1 %vm902_vm7, %v3308_v29 }
 0x911   :  { %v3346_v0 = vpop.f32.mrb[24].mxu1 }
 0x912   :  { %v2086_v3 = vadd.f32 %v3346_v0, %v1854_v2  ;;  %v2056_v45 = vpop.f32.mrb[25].mxu1 }
 0x913   :  { %v2085_v20 = vadd.f32 %v2056_v45, %v1853_v34 }
 0x914   :  { %v2102_v9 = vadd.f32 %v2096_v57, %v2086_v3 }
 0x915   :  { %v2101_v6 = vadd.f32 %v2095_v18, %v2085_v20  ;;  %v3349_v11 = vpop.f32.mrb[26].mxu1 }
 0x916   :  { %v2112_v62 = vadd.f32 %v2952_v19, %v2102_v9  ;;  %v2088_v16 = vadd.f32 %v3349_v11, %v1856_v5  ;;  %v2066_v17 = vpop.f32.mrb[27].mxu1  ;;  %v1600_v5 = vld [vmem:[%s4193_s4 + $0x7a] sm:$0xff]  ;;  %v2959_v9 = vld [vmem:[%s4193_s4 + $0x66] ss:$0 sm:$0xff] }
 0x917   :  { %v2111_v23 = vadd.f32 %v2952_v19, %v2101_v6  ;;  %v2087_v24 = vadd.f32 %v2066_v17, %v1855_v10  ;;  %3387 = vmatprep.subr.mxu1 %v1600_v5 }
 0x918   :  { %v2954_v26 = vmul.f32 -1.442695, %v2112_v62  ;;  %v2104_v51 = vadd.f32 %v2098_v15, %v2088_v16  ;;  %3388 = vmatpush3.msra.mxu1 %v1600_v5 }
 0x919   :  { %v2953_v30 = vmul.f32 -1.442695, %v2111_v23  ;;  %v2103_v28 = vadd.f32 %v2097_v22, %v2087_v24  ;;  %v3352_v39 = vpop.f32.mrb[28].mxu1 }
 0x91a   :  { %3605 = vpow2.f32 %v2954_v26  ;;  %v2114_v49 = vadd.f32 %v2952_v19, %v2104_v51  ;;  %v2090_v37 = vadd.f32 %v3352_v39, %v1858_v25  ;;  %v2076_v35 = vpop.f32.mrb[29].mxu1 }
 0x91b   :  { %3607 = vpow2.f32 %v2953_v30  ;;  %v2113_v61 = vadd.f32 %v2952_v19, %v2103_v28  ;;  %v2089_v60 = vadd.f32 %v2076_v35, %v1857_v14 }
 0x91c   :  { %v2956_v29 = vmul.f32 -1.442695, %v2114_v49  ;;  %v2106_v38 = vadd.f32 %v2100_v27, %v2090_v37 }
 0x91d   :  { %v2955_v50 = vmul.f32 -1.442695, %v2113_v61  ;;  %v2105_v53 = vadd.f32 %v2099_v46, %v2089_v60 }
 0x91e   :  { %3609 = vpow2.f32 %v2956_v29  ;;  %v2116_v56 = vadd.f32 %v2952_v19, %v2106_v38 }
 0x91f   :  { %3611 = vpow2.f32 %v2955_v50  ;;  %v2115_v58 = vadd.f32 %v2952_v19, %v2105_v53 }
 0x920   :  { %v2958_v59 = vmul.f32 -1.442695, %v2116_v56 }
 0x921   :  { %v2957_v63 = vmul.f32 -1.442695, %v2115_v58 }
 0x922   :  { %3613 = vpow2.f32 %v2958_v59 }
 0x923   :  { %3615 = vpow2.f32 %v2957_v63 }
 0x924   :  { %v3606_v36 = vpop.eup %3605 }
 0x925   :  { %v3608_v7 = vpop.eup %3607  ;;  %v2136_v4 = vadd.f32 1.0, %v3606_v36 }
 0x926   :  { %v2135_v40 = vadd.f32 1.0, %v3608_v7 }
 0x927   :  { %3617 = vrcp.f32 %v2136_v4 }
 0x928   :  { %v3610_v43 = vpop.eup %3609  ;;  %3619 = vrcp.f32 %v2135_v40 }
 0x929   :  { %v3612_v32 = vpop.eup %3611  ;;  %v2138_v33 = vadd.f32 1.0, %v3610_v43 }
 0x92a   :  { %v2137_v47 = vadd.f32 1.0, %v3612_v32 }
 0x92b   :  { %3621 = vrcp.f32 %v2138_v33 }
 0x92c   :  { %v3614_v41 = vpop.eup %3613  ;;  %3623 = vrcp.f32 %v2137_v47 }
 0x92d   :  { %v3616_v54 = vpop.eup %3615  ;;  %v2140_v55 = vadd.f32 1.0, %v3614_v41 }
 0x92e   :  { %v2139_v52 = vadd.f32 1.0, %v3616_v54 }
 0x92f   :  { %3625 = vrcp.f32 %v2140_v55  ;;  %v1599_v55 = vld [vmem:[%s4193_s4 + $0x72] sm:$0xff] }
 0x930   :  { %3627 = vrcp.f32 %v2139_v52  ;;  %3392 = vmatprep.subr.mxu1 %v1599_v55 }
 0x931   :  { %v3618_v31 = vpop.eup %3617 }
 0x932   :  { %v3620_v2 = vpop.eup %3619  ;;  %v2154_v34 = vmul.f32 %v3618_v31, %v2112_v62 }
 0x933   :  { %v2153_v1 = vmul.f32 %v3620_v2, %v2111_v23  ;;  %v1603_v2 = vld [vmem:[%s4193_s4 + $0x8b] sm:$0xff] }
 0x935   :  { %v3622_v0 = vpop.eup %3621  ;;  %3363 = vmatprep.mubr.msk.f32.mxu0 %vm2163_vm11, %v2153_v1 }
 0x936   :  { %v3624_v42 = vpop.eup %3623  ;;  %3364 = vmatmul.mubr.msk.f32.vlgmr.msra.gmra.mrb[38].mxu0 %vm2163_vm11, %v2154_v34  ;;  %v2156_v3 = vmul.f32 %v3622_v0, %v2114_v49  ;;  %v2979_v34 = vld [vmem:[%s4193_s4 + $0x82] ss:$0 sm:$0xff] }
 0x937   :  { %v2155_v57 = vmul.f32 %v3624_v42, %v2113_v61 }
 0x939   :  { %v3626_v45 = vpop.eup %3625  ;;  %3366 = vmatprep.mubr.msk.f32.mxu0 %vm2163_vm11, %v2155_v57 }
 0x93a   :  { %v3628_v18 = vpop.eup %3627  ;;  %3367 = vmatmul.mubr.msk.f32.gmra.mrb[40].mxu0 %vm2163_vm11, %v2156_v3  ;;  %v2158_v20 = vmul.f32 %v3626_v45, %v2116_v56 }
 0x93b   :  { %v2157_v19 = vmul.f32 %v3628_v18, %v2115_v58 }
 0x93d   :  { %3369 = vmatprep.mubr.msk.f32.mxu0 %vm2163_vm11, %v2157_v19 }
 0x93e   :  { %3370 = vmatmul.mubr.msk.f32.gmra.mrb[42].mxu0 %vm2163_vm11, %v2158_v20 }
 0x93f   :  { %3384 = vmatprep.mubr.msk.f32.mxu0 %vm1157_vm8, %v3974_v48 }
 0xa09   :  { %v3365_v10 = vpop.f32.mrb[38].mxu0 }
 0xa0a   :  { %v2257_v6 = vadd.f32 %v3365_v10, %v2959_v9  ;;  %v2251_v11 = vpop.f32.mrb[39].mxu0 }
 0xa0b   :  { %v2252_v12 = vadd.f32 %v2959_v9, %v2251_v11  ;;  %v2664_v11 = vld [vmem:[%s4193_s4 + $0x94] sm:$0xf] }
 0xa0c   :  { %v2968_v62 = vmul.f32 -1.442695, %v2257_v6 }
 0xa0d   :  { %v2967_v15 = vmul.f32 -1.442695, %v2252_v12  ;;  %v3368_v16 = vpop.f32.mrb[40].mxu0 }
 0xa0e   :  { %3629 = vpow2.f32 %v2968_v62  ;;  %v2267_v17 = vadd.f32 %v3368_v16, %v2959_v9  ;;  %v2261_v48 = vpop.f32.mrb[41].mxu0 }
 0xa0f   :  { %3631 = vpow2.f32 %v2967_v15  ;;  %v2262_v21 = vadd.f32 %v2959_v9, %v2261_v48  ;;  %v3664_v48 = vmov 0.0|0.0  }
 0xa10   :  { %v2970_v22 = vmul.f32 -1.442695, %v2267_v17 }
 0xa11   :  { %v2969_v23 = vmul.f32 -1.442695, %v2262_v21  ;;  %v3371_v24 = vpop.f32.mrb[42].mxu0 }
 0xa12   :  { %3633 = vpow2.f32 %v2970_v22  ;;  %v2277_v25 = vadd.f32 %v3371_v24, %v2959_v9  ;;  %v2271_v26 = vpop.f32.mrb[43].mxu0 }
 0xa13   :  { %3635 = vpow2.f32 %v2969_v23  ;;  %v2272_v51 = vadd.f32 %v2959_v9, %v2271_v26  ;;  %v2988_v26 = vld [vmem:[%s4193_s4 + $0x98] ss:$0 sm:$0xff] }
 0xa14   :  { %v2972_v27 = vmul.f32 -1.442695, %v2277_v25 }
 0xa15   :  { %v2971_v14 = vmul.f32 -1.442695, %v2272_v51 }
 0xa16   :  { %3637 = vpow2.f32 %v2972_v27 }
 0xa17   :  { %3639 = vpow2.f32 %v2971_v14 }
 0xa18   :  { %v3630_v30 = vpop.eup %3629 }
 0xa19   :  { %v3632_v28 = vpop.eup %3631  ;;  %v2299_v39 = vadd.f32 1.0, %v3630_v30 }
 0xa1a   :  { %v2298_v46 = vadd.f32 1.0, %v3632_v28 }
 0xa1b   :  { %3641 = vrcp.f32 %v2299_v39 }
 0xa1c   :  { %v3634_v49 = vpop.eup %3633  ;;  %3643 = vrcp.f32 %v2298_v46 }
 0xa1d   :  { %v3636_v37 = vpop.eup %3635  ;;  %v2301_v35 = vadd.f32 1.0, %v3634_v49 }
 0xa1e   :  { %v2300_v61 = vadd.f32 1.0, %v3636_v37 }
 0xa1f   :  { %3645 = vrcp.f32 %v2301_v35 }
 0xa20   :  { %v3638_v60 = vpop.eup %3637  ;;  %3647 = vrcp.f32 %v2300_v61 }
 0xa21   :  { %v3640_v29 = vpop.eup %3639  ;;  %v2303_v38 = vadd.f32 1.0, %v3638_v60 }
 0xa22   :  { %v2302_v50 = vadd.f32 1.0, %v3640_v29 }
 0xa23   :  { %3649 = vrcp.f32 %v2303_v38 }
 0xa24   :  { %3651 = vrcp.f32 %v2302_v50 }
 0xa25   :  { %v3642_v53 = vpop.eup %3641 }
 0xa26   :  { %v3644_v56 = vpop.eup %3643  ;;  %v2317_v58 = vmul.f32 %v3642_v53, %v2257_v6 }
 0xa27   :  { %v2316_v59 = vmul.f32 %v3644_v56, %v2252_v12  ;;  %v2982_v12 = vld [vmem:[%s4193_s4 + $0x93] ss:$0 sm:$0xff] }
 0xa29   :  { %v3646_v63 = vpop.eup %3645  ;;  %v3470_v36 = vpack.c.bf16 %v2317_v58, %v2316_v59 }
 0xa2a   :  { %v3648_v7 = vpop.eup %3647  ;;  %v2319_v4 = vmul.f32 %v3646_v63, %v2267_v17 }
 0xa2b   :  { %v2318_v40 = vmul.f32 %v3648_v7, %v2262_v21  ;;  %3471 = vmatprep.subr.bf16.mxu0 %v3470_v36  ;;  %v3666_v21 = vmov 0.0  }
 0xa2c   :  { %3473 = vmatpush3.bf16.msra.mxu0 %v3470_v36 }
 0xa2d   :  { %v3650_v43 = vpop.eup %3649  ;;  %v3474_v32 = vpack.c.bf16 %v2319_v4, %v2318_v40 }
 0xa2e   :  { %v3652_v33 = vpop.eup %3651  ;;  %v2321_v47 = vmul.f32 %v3650_v43, %v2277_v25  ;;  %v2749_v25 = vld [vmem:[%s4193_s4 + $0x99] sm:$0x3] }
 0xa2f   :  { %v2320_v41 = vmul.f32 %v3652_v33, %v2272_v51  ;;  %3475 = vmatprep.subr.bf16.mxu0 %v3474_v32 }
 0xa30   :  { %3477 = vmatpush3.bf16.msra.mxu0 %v3474_v32 }
 0xa31   :  { %v3478_v54 = vpack.c.bf16 %v2321_v47, %v2320_v41 }
 0xa33   :  { %3479 = vmatprep.subr.bf16.mxu0 %v3478_v54 }
 0xa34   :  { %3481 = vmatpush3.bf16.msra.mxu0 %v3478_v54 }
 0xa37   :  { %3385 = vmatmul.mubr.msk.f32.vlgmr.msra.gmra.mrb[44].mxu0 %vm1157_vm8, %v3976_v13  ;;  %v1602_v13 = vld [vmem:[%s4193_s4 + $0x83] sm:$0xff] }
 0xa38   :  { %v3482_v1 = vpack.c.bf16 %v1603_v2, %v1602_v13 }
 0xa3a   :  { %3483 = vmatprep.subr.bf16.mxu0 %v3482_v1 }
 0xa3b   :  { %3485 = vmatpush3.bf16.msra.mxu0 %v3482_v1 }
 0xa3c   :  { %3404 = vmatprep.subr.msk.mxu0 %vm757_vm3, %v2664_v11 }
 0xb0a   :  { %v3386_v52 = vpop.f32.mrb[44].mxu0 }
 0xb0b   :  { %v2388_v31 = vpop.f32.mrb[45].mxu0 }
 0xb0c   :  { %3389 = vmatprep.mubr.msk.f32.mxu1 %vm902_vm7, %v2388_v31 }
 0xb0d   :  { %3390 = vmatmul.mubr.msk.f32.vlgmr.msra.gmra.mrb[30].mxu1 %vm902_vm7, %v3386_v52 }
 0xb0e   :  { %3393 = vmatpush3.msra.mxu1 %v1599_v55  ;;  %3394 = vmatprep.mubr.msk.f32.mxu1 %vm902_vm7, %v4052_v8 }
 0xb0f   :  { %3486 = vmatprep.subr.bf16.mxu1 %v3664_v48 }
 0xb15   :  { %3395 = vmatmul.mubr.msk.f32.vlgmr.msra.gmra.mrb[30].mxu1 %vm902_vm7, %v4050_v44 }
 0xb16   :  { %3413 = vmatprep.mubr.msk.f32.mxu1 %vm3665_vm12, %v3666_v21 }
 0xbe8   :  { %v3396_v0 = vpop.f32.mrb[30].mxu1 }
 0xbe9   :  { %v2564_v8 = vadd.f32 %v3396_v0, %v2979_v34  ;;  %v2550_v42 = vpop.f32.mrb[31].mxu1 }
 0xbea   :  { %v2563_v57 = vadd.f32 %v2979_v34, %v2550_v42 }
 0xbeb   :  { %v2981_v44 = vmul.f32 -1.442695, %v2564_v8 }
 0xbec   :  { %v2980_v3 = vmul.f32 -1.442695, %v2563_v57 }
 0xbed   :  { %3653 = vpow2.f32 %v2981_v44 }
 0xbee   :  { %3655 = vpow2.f32 %v2980_v3 }
 0xbf7   :  { %v3654_v45 = vpop.eup %3653 }
 0xbf8   :  { %v3656_v18 = vpop.eup %3655  ;;  %v2572_v19 = vadd.f32 1.0, %v3654_v45 }
 0xbf9   :  { %v2571_v20 = vadd.f32 1.0, %v3656_v18 }
 0xbfa   :  { %3657 = vrcp.f32 %v2572_v19 }
 0xbfb   :  { %3659 = vrcp.f32 %v2571_v20 }
 0xc04   :  { %v3658_v5 = vpop.eup %3657 }
 0xc05   :  { %v3660_v9 = vpop.eup %3659  ;;  %v2578_v6 = vmul.f32 %v3658_v5, %v2564_v8 }
 0xc06   :  { %v2577_v10 = vmul.f32 %v3660_v9, %v2563_v57 }
 0xc08   :  { %3401 = vmatprep.mubr.msk.f32.mxu0 %vm87_vm0, %v2577_v10 }
 0xc09   :  { %3402 = vmatmul.mubr.msk.f32.vlgmr.msra.gmra.mrb[46].mxu0 %vm87_vm0, %v2578_v6 }
 0xc0a   :  { %3405 = vmatpush3.msk.msra.mxu0 %vm757_vm3, %v2664_v11 }
 0xcdc   :  { %v3403_v62 = vpop.f32.mrb[46].mxu0 }
 0xcdd   :  { %v2655_v15 = vpop.f32.mrb[47].mxu0  ;;  %v2661_v17 = vadd.f32 %v3403_v62, %v2982_v12 }
 0xcde   :  { %v2656_v16 = vadd.f32 %v2982_v12, %v2655_v15 }
 0xce0   :  { %3406 = vmatprep.mubr.msk.f32.mxu0 %vm1503_vm10, %v2656_v16 }
 0xce1   :  { %3407 = vmatmul.mubr.msk.f32.vlgmr.msra.gmra.mrb[48].mxu0 %vm1503_vm10, %v2661_v17 }
 0xdb4   :  { %v3408_v22 = vpop.f32.mrb[48].mxu0 }
 0xdb5   :  { %v2740_v23 = vpop.f32.mrb[49].mxu0 }
 0xdb6   :  { %v3487_v24 = vpack.c.bf16 %v3408_v22, %v2740_v23 }
 0xdb8   :  { %3488 = vmatpush3.bf16.msra.mxu1 %v3487_v24 }
 0xdbb   :  { %3414 = vmatmul.mubr.msk.f32.vlgmr.msra.gmra.mrb[32].mxu1 %vm87_vm0, %v2749_v25 }
 0xe8e   :  { %v2824_v51 = vpop.f32.mrb[32].mxu1 }
 0xe8f   :  { %v2825_v27 = vadd.f32 %v2988_v26, %v2824_v51  ;;  %v3415_v14 = vpop.f32.mrb[33].mxu1 }
 0xe91   :  { %2829 = vst.msk [vmem:[%s4195_s5] sm:$0x3] %vm2828_vm13, %v2825_v27 }

</bundles_post_ra>
